<compile_context>
chip_gen: v7x
topology: tpu7x:2x2x1
jax: 0.10.0
libtpu: 0.0.40
codegen_flags: <defaults>
</compile_context>

<pallas_src>
import functools
import math

import jax
import jax.numpy as jnp
from jax.experimental import pallas as pl
from jax.experimental.pallas import tpu as pltpu

EPS = 1e-5

D_IN, H1, H2, DZ, D_OUT = 176, 128, 64, 16, 176

DEFAULT_TILE_B = 1024                 # rows per grid tile for the tiled path (HBM-bound sweet spot)
FUSED_MAX_ROWS = 4096                 # batches up to this size take the single fused kernel
VMEM_LIMIT_BYTES = 32 * 1024 * 1024   # per-call working set is small; v7x-safe (64 MiB physical)

# bf16 MXU inputs + bf16 HBM intermediates (f32 accumulation, f32 BN/SiLU math).
MXU_DTYPE = jnp.bfloat16
ACT_DTYPE = jnp.bfloat16


def _cdiv(a, b):
    return -(-a // b)


def _round_up(a, m):
    return _cdiv(a, m) * m


def _silu(h, approx=True):
    # exp -> EUP slot; reciprocal -> EUP slot; keeps the divide off the VALU.
    return h * pl.reciprocal(1.0 + jnp.exp(-h), approx=approx)


def _valid_rows(tile_b, batch):
    # (tile_b, 1) mask of rows belonging to the real batch for this grid tile.
    r = pl.program_id(0) * tile_b + jax.lax.broadcasted_iota(jnp.int32, (tile_b, 1), 0)
    return r < batch


def _partial_stats(y, mask):
    # One-pass per-tile [sum, sum of squares] -> (1, 2, feat) f32.
    if mask is not None:
        y = jnp.where(mask, y, 0.0)
    s = jnp.sum(y, axis=0, keepdims=True)
    ss = jnp.sum(y * y, axis=0, keepdims=True)
    return jnp.concatenate([s, ss], axis=0)[None]


# ------------------------------ fused kernel ----------------------------------

def _fused_kernel(x_ref, w1_ref, g1_ref, be1_ref, w2_ref, g2_ref, be2_ref,
                  w3_ref, b3_ref, w34_ref, g4_ref, be4_ref,
                  w5_ref, g5_ref, be5_ref, w6_ref, b6_ref,
                  recon_ref, z_ref):
    # Whole batch resident in VMEM -> BN stats are exact full-batch, two-pass (robust).
    def bn_silu(y, g_ref, be_ref, approx=True):
        mu = jnp.mean(y, axis=0, keepdims=True)
        var = jnp.mean(jnp.square(y - mu), axis=0, keepdims=True)   # biased, training-mode
        scale = g_ref[...] * jax.lax.rsqrt(var + EPS)
        shift = be_ref[...] - mu * scale
        return _silu(y * scale + shift, approx=approx)

    xm = x_ref[...].astype(MXU_DTYPE)                                # in-kernel f32 -> bf16 cast
    y1 = jnp.dot(xm, w1_ref[...], preferred_element_type=jnp.float32)
    h1 = bn_silu(y1, g1_ref, be1_ref).astype(MXU_DTYPE)
    y2 = jnp.dot(h1, w2_ref[...], preferred_element_type=jnp.float32)
    h2 = bn_silu(y2, g2_ref, be2_ref).astype(MXU_DTYPE)

    z = jnp.dot(h2, w3_ref[...], preferred_element_type=jnp.float32) + b3_ref[...]
    z_ref[...] = z.astype(z_ref.dtype)

    # bottleneck fused: y4 = h2 @ (W3 @ W4); the constant (b3 @ W4 + b4) offset is exactly
    # cancelled by the decoder's first training-mode BN.
    y4 = jnp.dot(h2, w34_ref[...], preferred_element_type=jnp.float32)
    h4 = bn_silu(y4, g4_ref, be4_ref).astype(MXU_DTYPE)
    y5 = jnp.dot(h4, w5_ref[...], preferred_element_type=jnp.float32)
    h5 = bn_silu(y5, g5_ref, be5_ref, approx=False).astype(MXU_DTYPE)   # exact SiLU -> recon
    recon = jnp.dot(h5, w6_ref[...], preferred_element_type=jnp.float32) + b6_ref[...]
    recon_ref[...] = recon.astype(recon_ref.dtype)


# ----------------------------- tiled stage kernels ----------------------------

def _stage1_kernel(x_ref, w_ref, y_ref, ps_ref, *, tile_b, batch, needs_mask):
    # y1 = x @ W1   (b1 dropped: a per-feature constant is cancelled by the following BN)
    xm = x_ref[...].astype(w_ref.dtype)                              # in-kernel f32 -> bf16 cast
    y = jnp.dot(xm, w_ref[...], preferred_element_type=jnp.float32)
    y_ref[...] = y.astype(y_ref.dtype)
    mask = _valid_rows(tile_b, batch) if needs_mask else None
    ps_ref[...] = _partial_stats(y, mask)


def _mid_stage_kernel(y_in_ref, sc_ref, sh_ref, w_ref, y_ref, ps_ref, *,
                      tile_b, batch, needs_mask):
    # y_out = silu(bn(y_in)) @ W      (bias dropped: cancelled by the next BN)
    h = _silu(y_in_ref[...].astype(jnp.float32) * sc_ref[...] + sh_ref[...])
    y = jnp.dot(h.astype(w_ref.dtype), w_ref[...], preferred_element_type=jnp.float32)
    y_ref[...] = y.astype(y_ref.dtype)
    mask = _valid_rows(tile_b, batch) if needs_mask else None
    ps_ref[...] = _partial_stats(y, mask)


def _bottleneck_kernel(y_in_ref, sc_ref, sh_ref, wz_ref, bz_ref, w34_ref,
                       z_ref, y_ref, ps_ref, *, tile_b, batch, needs_mask):
    # h2 = silu(bn(y2)); z = h2 @ W3 + b3 (latent output); y4 = h2 @ (W3 @ W4)
    h = _silu(y_in_ref[...].astype(jnp.float32) * sc_ref[...] + sh_ref[...])
    hm = h.astype(wz_ref.dtype)
    z = jnp.dot(hm, wz_ref[...], preferred_element_type=jnp.float32) + bz_ref[...]
    z_ref[...] = z.astype(z_ref.dtype)
    y = jnp.dot(hm, w34_ref[...], preferred_element_type=jnp.float32)
    y_ref[...] = y.astype(y_ref.dtype)
    mask = _valid_rows(tile_b, batch) if needs_mask else None
    ps_ref[...] = _partial_stats(y, mask)


def _last_stage_kernel(y_in_ref, sc_ref, sh_ref, w_ref, b_ref, out_ref):
    # recon = silu(bn(y5)) @ W6 + b6, written at its natural 176-lane width
    h = _silu(y_in_ref[...].astype(jnp.float32) * sc_ref[...] + sh_ref[...], approx=False)
    out = jnp.dot(h.astype(w_ref.dtype), w_ref[...],
                  preferred_element_type=jnp.float32) + b_ref[...]
    out_ref[...] = out.astype(out_ref.dtype)


# ----------------------------- params / wrapper -------------------------------

def init_params(key):
    """Parameters mirroring the torch module: Linear weights stored (in, out),
    biases / BN gamma / BN beta stored (1, out). All float32."""
    dims = [(D_IN, H1), (H1, H2), (H2, DZ), (DZ, H2), (H2, H1), (H1, D_OUT)]
    bn_after = [True, True, False, True, True, False]
    params = []
    keys = jax.random.split(key, len(dims))
    for (din, dout), has_bn, k in zip(dims, bn_after, keys):
        kw, kb = jax.random.split(k)
        bound = 1.0 / math.sqrt(din)
        w = jax.random.uniform(kw, (din, dout), jnp.float32, -bound, bound)
        b = jax.random.uniform(kb, (1, dout), jnp.float32, -bound, bound)
        params += [w, b]
        if has_bn:
            params += [jnp.ones((1, dout), jnp.float32),    # gamma
                       jnp.zeros((1, dout), jnp.float32)]   # beta
    return params


def _bytes_of(arrs):
    return sum(math.prod(a.shape) * jnp.dtype(a.dtype).itemsize for a in arrs)


def ae_forward(x, params, *, tile_b=None, fused=None):
    (w1, b1, g1, be1,
     w2, b2, g2, be2,
     w3, b3,
     w4, b4, g4, be4,
     w5, b5, g5, be5,
     w6, b6) = params
    del b1, b2, b4, b5   # exactly cancelled by the training-mode BN that follows each layer

    B, F = x.shape
    assert F == D_IN

    # ---- operand prep (tiny, plain XLA: weights only, never the batch) ----
    w1m = w1.astype(MXU_DTYPE)
    w2m = w2.astype(MXU_DTYPE)
    w3m = w3.astype(MXU_DTYPE)
    w34m = jnp.dot(w3, w4).astype(MXU_DTYPE)                 # fused 64x64 bottleneck
    w5m = w5.astype(MXU_DTYPE)
    w6m = w6.astype(MXU_DTYPE)

    if fused is None:
        fused = B <= FUSED_MAX_ROWS

    # ---------------- fused single-call path (activations resident in VMEM) ----------------
    if fused:
        operands = (x, w1m, g1, be1, w2m, g2, be2, w3m, b3, w34m,
                    g4, be4, w5m, g5, be5, w6m, b6)
        out_shape = (jax.ShapeDtypeStruct((B, D_OUT), jnp.float32),
                     jax.ShapeDtypeStruct((B, DZ), jnp.float32))
        flops = 2 * B * (D_IN * H1 + H1 * H2 + H2 * (DZ + H2) + H2 * H1 + H1 * D_OUT)
        trans = B * (H1 + H2 + H2 + H1)
        nbytes = _bytes_of(operands) + _bytes_of(out_shape)
        recon, z = pl.pallas_call(
            _fused_kernel,
            out_shape=out_shape,
            compiler_params=pltpu.CompilerParams(vmem_limit_bytes=VMEM_LIMIT_BYTES),
            cost_estimate=pl.CostEstimate(flops=int(flops), transcendentals=int(trans),
                                          bytes_accessed=int(nbytes)),
        )(*operands)
        return recon, z

    # ---------------- tiled multi-stage path (large batches) ----------------
    if tile_b is None:
        tile_b = DEFAULT_TILE_B
    # keep >= 2 grid tiles when the batch allows it (v7x megacore sharding);
    # 16-row rounding keeps bf16 sublane packing happy.
    tile_b = min(tile_b, _round_up(_cdiv(B, 2), 16))
    tile_b = max(16, _round_up(tile_b, 16))
    num_tiles = _cdiv(B, tile_b)
    needs_mask = (B % tile_b) != 0     # ragged tail tile: stats masked, OOB writes discarded

    # ---- spec helpers ----
    def tile_spec(feat):
        return pl.BlockSpec((tile_b, feat), lambda i: (i, 0))

    def full_spec(a):
        nd = a.ndim
        return pl.BlockSpec(a.shape, lambda i, nd=nd: (0,) * nd)

    def stat_spec(feat):
        return pl.BlockSpec((1, 2, feat), lambda i: (i, 0, 0))

    def stage(kernel, operands, in_specs, out_specs, out_shape, flops, trans):
        outs = out_shape if isinstance(out_shape, tuple) else (out_shape,)
        nbytes = _bytes_of(tuple(operands) + outs)
        return pl.pallas_call(
            kernel,
            grid=(num_tiles,),
            in_specs=in_specs,
            out_specs=out_specs,
            out_shape=out_shape,
            compiler_params=pltpu.CompilerParams(
                dimension_semantics=("parallel",),        # megacore sharding on v7x
                vmem_limit_bytes=VMEM_LIMIT_BYTES),
            cost_estimate=pl.CostEstimate(
                flops=int(flops), transcendentals=int(trans),
                bytes_accessed=int(nbytes)),
        )(*operands)

    def bn_fold(ps, gamma, beta):
        # Exact full-batch mean / biased variance from per-tile partial sums (one-pass).
        tot = jnp.sum(ps, axis=0)                             # (2, feat)
        mu = tot[0:1] / B
        var = jnp.maximum(tot[1:2] / B - mu * mu, 0.0)
        scale = gamma * jax.lax.rsqrt(var + EPS)
        shift = beta - mu * scale
        return scale, shift

    mk = dict(tile_b=tile_b, batch=B, needs_mask=needs_mask)

    # ---- S1: y1 = x @ W1, stats(y1) ----
    y1, ps1 = stage(
        functools.partial(_stage1_kernel, **mk),
        (x, w1m),
        [tile_spec(D_IN), full_spec(w1m)],
        (tile_spec(H1), stat_spec(H1)),
        (jax.ShapeDtypeStruct((B, H1), ACT_DTYPE),
         jax.ShapeDtypeStruct((num_tiles, 2, H1), jnp.float32)),
        flops=2 * B * D_IN * H1, trans=0)

    # ---- S2: y2 = silu(bn(y1)) @ W2, stats(y2) ----
    sc1, sh1 = bn_fold(ps1, g1, be1)
    y2, ps2 = stage(
        functools.partial(_mid_stage_kernel, **mk),
        (y1, sc1, sh1, w2m),
        [tile_spec(H1), full_spec(sc1), full_spec(sh1), full_spec(w2m)],
        (tile_spec(H2), stat_spec(H2)),
        (jax.ShapeDtypeStruct((B, H2), ACT_DTYPE),
         jax.ShapeDtypeStruct((num_tiles, 2, H2), jnp.float32)),
        flops=2 * B * H1 * H2, trans=2 * B * H1)

    # ---- S3: z = h2 @ W3 + b3 ; y4 = h2 @ (W3 @ W4), stats(y4) ----
    sc2, sh2 = bn_fold(ps2, g2, be2)
    z, y4, ps4 = stage(
        functools.partial(_bottleneck_kernel, **mk),
        (y2, sc2, sh2, w3m, b3, w34m),
        [tile_spec(H2), full_spec(sc2), full_spec(sh2),
         full_spec(w3m), full_spec(b3), full_spec(w34m)],
        (tile_spec(DZ), tile_spec(H2), stat_spec(H2)),
        (jax.ShapeDtypeStruct((B, DZ), jnp.float32),
         jax.ShapeDtypeStruct((B, H2), ACT_DTYPE),
         jax.ShapeDtypeStruct((num_tiles, 2, H2), jnp.float32)),
        flops=2 * B * H2 * (DZ + H2), trans=2 * B * H2)

    # ---- S4: y5 = silu(bn(y4)) @ W5, stats(y5) ----
    sc4, sh4 = bn_fold(ps4, g4, be4)
    y5, ps5 = stage(
        functools.partial(_mid_stage_kernel, **mk),
        (y4, sc4, sh4, w5m),
        [tile_spec(H2), full_spec(sc4), full_spec(sh4), full_spec(w5m)],
        (tile_spec(H1), stat_spec(H1)),
        (jax.ShapeDtypeStruct((B, H1), ACT_DTYPE),
         jax.ShapeDtypeStruct((num_tiles, 2, H1), jnp.float32)),
        flops=2 * B * H2 * H1, trans=2 * B * H2)

    # ---- S5: recon = silu(bn(y5)) @ W6 + b6 (natural 176-lane store) ----
    sc5, sh5 = bn_fold(ps5, g5, be5)
    recon = stage(
        _last_stage_kernel,
        (y5, sc5, sh5, w6m, b6),
        [tile_spec(H1), full_spec(sc5), full_spec(sh5),
         full_spec(w6m), full_spec(b6)],
        tile_spec(D_OUT),
        jax.ShapeDtypeStruct((B, D_OUT), jnp.float32),
        flops=2 * B * H1 * D_OUT, trans=2 * B * H1)

    return recon, z


# ----------------------------- pure-JAX reference -----------------------------

def ae_reference(x, params):
    """f32 reference with the original (un-fused, biased) parameterization."""
    (w1, b1, g1, be1,
     w2, b2, g2, be2,
     w3, b3,
     w4, b4, g4, be4,
     w5, b5, g5, be5,
     w6, b6) = params

    def bn_silu(h, g, be):
        mu = jnp.mean(h, axis=0, keepdims=True)
        var = jnp.mean((h - mu) ** 2, axis=0, keepdims=True)
        hn = (h - mu) / jnp.sqrt(var + EPS) * g + be
        return hn * jax.nn.sigmoid(hn)

    h = bn_silu(x @ w1 + b1, g1, be1)
    h = bn_silu(h @ w2 + b2, g2, be2)
    z = h @ w3 + b3
    d = bn_silu(z @ w4 + b4, g4, be4)
    d = bn_silu(d @ w5 + b5, g5, be5)
    return d @ w6 + b6, z


if __name__ == "__main__":
    key = jax.random.PRNGKey(0)
    kx, kp = jax.random.split(key)
    params = init_params(kp)

    def check(B, recon, z, x):
        assert recon.shape == (B, D_OUT) and recon.dtype == jnp.float32
        assert z.shape == (B, DZ) and z.dtype == jnp.float32
        recon_ref, z_ref = ae_reference(x, params)
        err_r = float(jnp.max(jnp.abs(recon - recon_ref)))
        err_z = float(jnp.max(jnp.abs(z - z_ref)))
        # bf16 MXU inputs / bf16 intermediates => small drift vs the f32 reference.
        assert err_r < 0.25 and err_z < 0.25, (B, err_r, err_z)

    # Fused single-call path (default for small batches). B=40 exercises a batch that is
    # not a multiple of the sublane count.
    fwd_fused = jax.jit(ae_forward)
    for B in (64, 40):
        x = jax.random.normal(jax.random.fold_in(kx, B), (B, D_IN), jnp.float32)
        recon, z = fwd_fused(x, params)
        jax.block_until_ready((recon, z))
        check(B, recon, z, x)

    # Tiled multi-stage path, forced at a small tile to exercise the grid. B=128 hits the
    # exact-tile path; B=200 hits the ragged tail tile (partial blocks + row-masked stats).
    fwd_tiled = jax.jit(functools.partial(ae_forward, fused=False, tile_b=64))
    for B in (128, 200):
        x = jax.random.normal(jax.random.fold_in(kx, 1000 + B), (B, D_IN), jnp.float32)
        recon, z = fwd_tiled(x, params)
        jax.block_until_ready((recon, z))
        check(B, recon, z, x)

    print("KERNEL_OK")
</pallas_src>

<mosaic_0001>
module attributes {stable_mosaic.version = 11 : i64} {
  func.func @_fused_kernel(%arg0: memref<64x176xf32, #tpu.memory_space<vmem>>, %arg1: memref<176x128xbf16, #tpu.memory_space<vmem>>, %arg2: memref<1x128xf32, #tpu.memory_space<vmem>>, %arg3: memref<1x128xf32, #tpu.memory_space<vmem>>, %arg4: memref<128x64xbf16, #tpu.memory_space<vmem>>, %arg5: memref<1x64xf32, #tpu.memory_space<vmem>>, %arg6: memref<1x64xf32, #tpu.memory_space<vmem>>, %arg7: memref<64x16xbf16, #tpu.memory_space<vmem>>, %arg8: memref<1x16xf32, #tpu.memory_space<vmem>>, %arg9: memref<64x64xbf16, #tpu.memory_space<vmem>>, %arg10: memref<1x64xf32, #tpu.memory_space<vmem>>, %arg11: memref<1x64xf32, #tpu.memory_space<vmem>>, %arg12: memref<64x128xbf16, #tpu.memory_space<vmem>>, %arg13: memref<1x128xf32, #tpu.memory_space<vmem>>, %arg14: memref<1x128xf32, #tpu.memory_space<vmem>>, %arg15: memref<128x176xbf16, #tpu.memory_space<vmem>>, %arg16: memref<1x176xf32, #tpu.memory_space<vmem>>, %arg17: memref<64x176xf32, #tpu.memory_space<vmem>>, %arg18: memref<64x16xf32, #tpu.memory_space<vmem>>) attributes {dimension_semantics = [], scalar_prefetch = 0 : i64, scratch_operands = 0 : i64, tpu.core_type = #tpu.core_type<tc>} {
    %c0 = arith.constant 0 : index
    %c0_0 = arith.constant 0 : index
    %0 = vector.load %arg0[%c0, %c0_0] : memref<64x176xf32, #tpu.memory_space<vmem>>, vector<64x176xf32>
    %1 = arith.truncf %0 : vector<64x176xf32> to vector<64x176xbf16>
    %c0_1 = arith.constant 0 : index
    %c0_2 = arith.constant 0 : index
    %2 = vector.load %arg1[%c0_1, %c0_2] : memref<176x128xbf16, #tpu.memory_space<vmem>>, vector<176x128xbf16>
    %cst = arith.constant dense<0.000000e+00> : vector<64x128xf32>
    %3 = tpu.matmul %1, %2, %cst {dimension_numbers = #tpu.dot_dimension_numbers<[1], [0], [0], [1], [0, 0, 1, 1], [], []>} : vector<64x176xbf16>, vector<176x128xbf16>, vector<64x128xf32> -> vector<64x128xf32>
    %cst_3 = arith.constant dense<0.000000e+00> : vector<128xf32>
    %4 = vector.multi_reduction <add>, %3, %cst_3 [0] : vector<64x128xf32> to vector<128xf32>
    %5 = vector.shape_cast %4 : vector<128xf32> to vector<1x128xf32>
    %cst_4 = arith.constant 6.400000e+01 : f32
    %6 = vector.broadcast %cst_4 : f32 to vector<1x128xf32>
    %7 = arith.divf %5, %6 : vector<1x128xf32>
    %8 = vector.broadcast %7 : vector<1x128xf32> to vector<64x128xf32>
    %9 = arith.subf %3, %8 : vector<64x128xf32>
    %10 = arith.mulf %9, %9 : vector<64x128xf32>
    %cst_5 = arith.constant dense<0.000000e+00> : vector<128xf32>
    %11 = vector.multi_reduction <add>, %10, %cst_5 [0] : vector<64x128xf32> to vector<128xf32>
    %12 = vector.shape_cast %11 : vector<128xf32> to vector<1x128xf32>
    %cst_6 = arith.constant 6.400000e+01 : f32
    %13 = vector.broadcast %cst_6 : f32 to vector<1x128xf32>
    %14 = arith.divf %12, %13 : vector<1x128xf32>
    %c0_7 = arith.constant 0 : index
    %c0_8 = arith.constant 0 : index
    %15 = vector.load %arg2[%c0_7, %c0_8] : memref<1x128xf32, #tpu.memory_space<vmem>>, vector<1x128xf32>
    %cst_9 = arith.constant 9.99999974E-6 : f32
    %16 = vector.broadcast %cst_9 : f32 to vector<1x128xf32>
    %17 = arith.addf %14, %16 : vector<1x128xf32>
    %18 = math.rsqrt %17 : vector<1x128xf32>
    %19 = arith.mulf %15, %18 : vector<1x128xf32>
    %c0_10 = arith.constant 0 : index
    %c0_11 = arith.constant 0 : index
    %20 = vector.load %arg3[%c0_10, %c0_11] : memref<1x128xf32, #tpu.memory_space<vmem>>, vector<1x128xf32>
    %21 = arith.mulf %7, %19 : vector<1x128xf32>
    %22 = arith.subf %20, %21 : vector<1x128xf32>
    %23 = vector.broadcast %19 : vector<1x128xf32> to vector<64x128xf32>
    %24 = arith.mulf %3, %23 : vector<64x128xf32>
    %25 = vector.broadcast %22 : vector<1x128xf32> to vector<64x128xf32>
    %26 = arith.addf %24, %25 : vector<64x128xf32>
    %cst_12 = arith.constant 0.000000e+00 : f32
    %27 = vector.broadcast %cst_12 : f32 to vector<64x128xf32>
    %28 = arith.subf %27, %26 : vector<64x128xf32>
    %29 = math.exp %28 : vector<64x128xf32>
    %cst_13 = arith.constant 1.000000e+00 : f32
    %30 = vector.broadcast %cst_13 : f32 to vector<64x128xf32>
    %31 = arith.addf %30, %29 : vector<64x128xf32>
    %32 = tpu.reciprocal %31 {approx = true} : vector<64x128xf32> -> vector<64x128xf32>
    %33 = arith.mulf %26, %32 : vector<64x128xf32>
    %34 = arith.truncf %33 : vector<64x128xf32> to vector<64x128xbf16>
    %c0_14 = arith.constant 0 : index
    %c0_15 = arith.constant 0 : index
    %35 = vector.load %arg4[%c0_14, %c0_15] : memref<128x64xbf16, #tpu.memory_space<vmem>>, vector<128x64xbf16>
    %cst_16 = arith.constant dense<0.000000e+00> : vector<64x64xf32>
    %36 = tpu.matmul %34, %35, %cst_16 {dimension_numbers = #tpu.dot_dimension_numbers<[1], [0], [0], [1], [0, 0, 1, 1], [], []>} : vector<64x128xbf16>, vector<128x64xbf16>, vector<64x64xf32> -> vector<64x64xf32>
    %cst_17 = arith.constant dense<0.000000e+00> : vector<64xf32>
    %37 = vector.multi_reduction <add>, %36, %cst_17 [0] : vector<64x64xf32> to vector<64xf32>
    %38 = vector.shape_cast %37 : vector<64xf32> to vector<1x64xf32>
    %cst_18 = arith.constant 6.400000e+01 : f32
    %39 = vector.broadcast %cst_18 : f32 to vector<1x64xf32>
    %40 = arith.divf %38, %39 : vector<1x64xf32>
    %41 = vector.broadcast %40 : vector<1x64xf32> to vector<64x64xf32>
    %42 = arith.subf %36, %41 : vector<64x64xf32>
    %43 = arith.mulf %42, %42 : vector<64x64xf32>
    %cst_19 = arith.constant dense<0.000000e+00> : vector<64xf32>
    %44 = vector.multi_reduction <add>, %43, %cst_19 [0] : vector<64x64xf32> to vector<64xf32>
    %45 = vector.shape_cast %44 : vector<64xf32> to vector<1x64xf32>
    %cst_20 = arith.constant 6.400000e+01 : f32
    %46 = vector.broadcast %cst_20 : f32 to vector<1x64xf32>
    %47 = arith.divf %45, %46 : vector<1x64xf32>
    %c0_21 = arith.constant 0 : index
    %c0_22 = arith.constant 0 : index
    %48 = vector.load %arg5[%c0_21, %c0_22] : memref<1x64xf32, #tpu.memory_space<vmem>>, vector<1x64xf32>
    %cst_23 = arith.constant 9.99999974E-6 : f32
    %49 = vector.broadcast %cst_23 : f32 to vector<1x64xf32>
    %50 = arith.addf %47, %49 : vector<1x64xf32>
    %51 = math.rsqrt %50 : vector<1x64xf32>
    %52 = arith.mulf %48, %51 : vector<1x64xf32>
    %c0_24 = arith.constant 0 : index
    %c0_25 = arith.constant 0 : index
    %53 = vector.load %arg6[%c0_24, %c0_25] : memref<1x64xf32, #tpu.memory_space<vmem>>, vector<1x64xf32>
    %54 = arith.mulf %40, %52 : vector<1x64xf32>
    %55 = arith.subf %53, %54 : vector<1x64xf32>
    %56 = vector.broadcast %52 : vector<1x64xf32> to vector<64x64xf32>
    %57 = arith.mulf %36, %56 : vector<64x64xf32>
    %58 = vector.broadcast %55 : vector<1x64xf32> to vector<64x64xf32>
    %59 = arith.addf %57, %58 : vector<64x64xf32>
    %cst_26 = arith.constant 0.000000e+00 : f32
    %60 = vector.broadcast %cst_26 : f32 to vector<64x64xf32>
    %61 = arith.subf %60, %59 : vector<64x64xf32>
    %62 = math.exp %61 : vector<64x64xf32>
    %cst_27 = arith.constant 1.000000e+00 : f32
    %63 = vector.broadcast %cst_27 : f32 to vector<64x64xf32>
    %64 = arith.addf %63, %62 : vector<64x64xf32>
    %65 = tpu.reciprocal %64 {approx = true} : vector<64x64xf32> -> vector<64x64xf32>
    %66 = arith.mulf %59, %65 : vector<64x64xf32>
    %67 = arith.truncf %66 : vector<64x64xf32> to vector<64x64xbf16>
    %c0_28 = arith.constant 0 : index
    %c0_29 = arith.constant 0 : index
    %68 = vector.load %arg7[%c0_28, %c0_29] : memref<64x16xbf16, #tpu.memory_space<vmem>>, vector<64x16xbf16>
    %cst_30 = arith.constant dense<0.000000e+00> : vector<64x16xf32>
    %69 = tpu.matmul %67, %68, %cst_30 {dimension_numbers = #tpu.dot_dimension_numbers<[1], [0], [0], [1], [0, 0, 1, 1], [], []>} : vector<64x64xbf16>, vector<64x16xbf16>, vector<64x16xf32> -> vector<64x16xf32>
    %c0_31 = arith.constant 0 : index
    %c0_32 = arith.constant 0 : index
    %70 = vector.load %arg8[%c0_31, %c0_32] : memref<1x16xf32, #tpu.memory_space<vmem>>, vector<1x16xf32>
    %71 = vector.broadcast %70 : vector<1x16xf32> to vector<64x16xf32>
    %72 = arith.addf %69, %71 : vector<64x16xf32>
    %c0_33 = arith.constant 0 : index
    %c0_34 = arith.constant 0 : index
    %73 = vector.load %arg18[%c0_33, %c0_34] : memref<64x16xf32, #tpu.memory_space<vmem>>, vector<64x16xf32>
    tpu.vector_store %arg18[%c0_33, %c0_34], %72 {strides = array<i32>} : memref<64x16xf32, #tpu.memory_space<vmem>>, vector<64x16xf32>,
    %c0_35 = arith.constant 0 : index
    %c0_36 = arith.constant 0 : index
    %74 = vector.load %arg9[%c0_35, %c0_36] : memref<64x64xbf16, #tpu.memory_space<vmem>>, vector<64x64xbf16>
    %cst_37 = arith.constant dense<0.000000e+00> : vector<64x64xf32>
    %75 = tpu.matmul %67, %74, %cst_37 {dimension_numbers = #tpu.dot_dimension_numbers<[1], [0], [0], [1], [0, 0, 1, 1], [], []>} : vector<64x64xbf16>, vector<64x64xbf16>, vector<64x64xf32> -> vector<64x64xf32>
    %cst_38 = arith.constant dense<0.000000e+00> : vector<64xf32>
    %76 = vector.multi_reduction <add>, %75, %cst_38 [0] : vector<64x64xf32> to vector<64xf32>
    %77 = vector.shape_cast %76 : vector<64xf32> to vector<1x64xf32>
    %cst_39 = arith.constant 6.400000e+01 : f32
    %78 = vector.broadcast %cst_39 : f32 to vector<1x64xf32>
    %79 = arith.divf %77, %78 : vector<1x64xf32>
    %80 = vector.broadcast %79 : vector<1x64xf32> to vector<64x64xf32>
    %81 = arith.subf %75, %80 : vector<64x64xf32>
    %82 = arith.mulf %81, %81 : vector<64x64xf32>
    %cst_40 = arith.constant dense<0.000000e+00> : vector<64xf32>
    %83 = vector.multi_reduction <add>, %82, %cst_40 [0] : vector<64x64xf32> to vector<64xf32>
    %84 = vector.shape_cast %83 : vector<64xf32> to vector<1x64xf32>
    %cst_41 = arith.constant 6.400000e+01 : f32
    %85 = vector.broadcast %cst_41 : f32 to vector<1x64xf32>
    %86 = arith.divf %84, %85 : vector<1x64xf32>
    %c0_42 = arith.constant 0 : index
    %c0_43 = arith.constant 0 : index
    %87 = vector.load %arg10[%c0_42, %c0_43] : memref<1x64xf32, #tpu.memory_space<vmem>>, vector<1x64xf32>
    %cst_44 = arith.constant 9.99999974E-6 : f32
    %88 = vector.broadcast %cst_44 : f32 to vector<1x64xf32>
    %89 = arith.addf %86, %88 : vector<1x64xf32>
    %90 = math.rsqrt %89 : vector<1x64xf32>
    %91 = arith.mulf %87, %90 : vector<1x64xf32>
    %c0_45 = arith.constant 0 : index
    %c0_46 = arith.constant 0 : index
    %92 = vector.load %arg11[%c0_45, %c0_46] : memref<1x64xf32, #tpu.memory_space<vmem>>, vector<1x64xf32>
    %93 = arith.mulf %79, %91 : vector<1x64xf32>
    %94 = arith.subf %92, %93 : vector<1x64xf32>
    %95 = vector.broadcast %91 : vector<1x64xf32> to vector<64x64xf32>
    %96 = arith.mulf %75, %95 : vector<64x64xf32>
    %97 = vector.broadcast %94 : vector<1x64xf32> to vector<64x64xf32>
    %98 = arith.addf %96, %97 : vector<64x64xf32>
    %cst_47 = arith.constant 0.000000e+00 : f32
    %99 = vector.broadcast %cst_47 : f32 to vector<64x64xf32>
    %100 = arith.subf %99, %98 : vector<64x64xf32>
    %101 = math.exp %100 : vector<64x64xf32>
    %cst_48 = arith.constant 1.000000e+00 : f32
    %102 = vector.broadcast %cst_48 : f32 to vector<64x64xf32>
    %103 = arith.addf %102, %101 : vector<64x64xf32>
    %104 = tpu.reciprocal %103 {approx = true} : vector<64x64xf32> -> vector<64x64xf32>
    %105 = arith.mulf %98, %104 : vector<64x64xf32>
    %106 = arith.truncf %105 : vector<64x64xf32> to vector<64x64xbf16>
    %c0_49 = arith.constant 0 : index
    %c0_50 = arith.constant 0 : index
    %107 = vector.load %arg12[%c0_49, %c0_50] : memref<64x128xbf16, #tpu.memory_space<vmem>>, vector<64x128xbf16>
    %cst_51 = arith.constant dense<0.000000e+00> : vector<64x128xf32>
    %108 = tpu.matmul %106, %107, %cst_51 {dimension_numbers = #tpu.dot_dimension_numbers<[1], [0], [0], [1], [0, 0, 1, 1], [], []>} : vector<64x64xbf16>, vector<64x128xbf16>, vector<64x128xf32> -> vector<64x128xf32>
    %cst_52 = arith.constant dense<0.000000e+00> : vector<128xf32>
    %109 = vector.multi_reduction <add>, %108, %cst_52 [0] : vector<64x128xf32> to vector<128xf32>
    %110 = vector.shape_cast %109 : vector<128xf32> to vector<1x128xf32>
    %cst_53 = arith.constant 6.400000e+01 : f32
    %111 = vector.broadcast %cst_53 : f32 to vector<1x128xf32>
    %112 = arith.divf %110, %111 : vector<1x128xf32>
    %113 = vector.broadcast %112 : vector<1x128xf32> to vector<64x128xf32>
    %114 = arith.subf %108, %113 : vector<64x128xf32>
    %115 = arith.mulf %114, %114 : vector<64x128xf32>
    %cst_54 = arith.constant dense<0.000000e+00> : vector<128xf32>
    %116 = vector.multi_reduction <add>, %115, %cst_54 [0] : vector<64x128xf32> to vector<128xf32>
    %117 = vector.shape_cast %116 : vector<128xf32> to vector<1x128xf32>
    %cst_55 = arith.constant 6.400000e+01 : f32
    %118 = vector.broadcast %cst_55 : f32 to vector<1x128xf32>
    %119 = arith.divf %117, %118 : vector<1x128xf32>
    %c0_56 = arith.constant 0 : index
    %c0_57 = arith.constant 0 : index
    %120 = vector.load %arg13[%c0_56, %c0_57] : memref<1x128xf32, #tpu.memory_space<vmem>>, vector<1x128xf32>
    %cst_58 = arith.constant 9.99999974E-6 : f32
    %121 = vector.broadcast %cst_58 : f32 to vector<1x128xf32>
    %122 = arith.addf %119, %121 : vector<1x128xf32>
    %123 = math.rsqrt %122 : vector<1x128xf32>
    %124 = arith.mulf %120, %123 : vector<1x128xf32>
    %c0_59 = arith.constant 0 : index
    %c0_60 = arith.constant 0 : index
    %125 = vector.load %arg14[%c0_59, %c0_60] : memref<1x128xf32, #tpu.memory_space<vmem>>, vector<1x128xf32>
    %126 = arith.mulf %112, %124 : vector<1x128xf32>
    %127 = arith.subf %125, %126 : vector<1x128xf32>
    %128 = vector.broadcast %124 : vector<1x128xf32> to vector<64x128xf32>
    %129 = arith.mulf %108, %128 : vector<64x128xf32>
    %130 = vector.broadcast %127 : vector<1x128xf32> to vector<64x128xf32>
    %131 = arith.addf %129, %130 : vector<64x128xf32>
    %cst_61 = arith.constant 0.000000e+00 : f32
    %132 = vector.broadcast %cst_61 : f32 to vector<64x128xf32>
    %133 = arith.subf %132, %131 : vector<64x128xf32>
    %134 = math.exp %133 : vector<64x128xf32>
    %cst_62 = arith.constant 1.000000e+00 : f32
    %135 = vector.broadcast %cst_62 : f32 to vector<64x128xf32>
    %136 = arith.addf %135, %134 : vector<64x128xf32>
    %137 = tpu.reciprocal %136 : vector<64x128xf32> -> vector<64x128xf32>
    %138 = arith.mulf %131, %137 : vector<64x128xf32>
    %139 = arith.truncf %138 : vector<64x128xf32> to vector<64x128xbf16>
    %c0_63 = arith.constant 0 : index
    %c0_64 = arith.constant 0 : index
    %140 = vector.load %arg15[%c0_63, %c0_64] : memref<128x176xbf16, #tpu.memory_space<vmem>>, vector<128x176xbf16>
    %cst_65 = arith.constant dense<0.000000e+00> : vector<64x176xf32>
    %141 = tpu.matmul %139, %140, %cst_65 {dimension_numbers = #tpu.dot_dimension_numbers<[1], [0], [0], [1], [0, 0, 1, 1], [], []>} : vector<64x128xbf16>, vector<128x176xbf16>, vector<64x176xf32> -> vector<64x176xf32>
    %c0_66 = arith.constant 0 : index
    %c0_67 = arith.constant 0 : index
    %142 = vector.load %arg16[%c0_66, %c0_67] : memref<1x176xf32, #tpu.memory_space<vmem>>, vector<1x176xf32>
    %143 = vector.broadcast %142 : vector<1x176xf32> to vector<64x176xf32>
    %144 = arith.addf %141, %143 : vector<64x176xf32>
    %c0_68 = arith.constant 0 : index
    %c0_69 = arith.constant 0 : index
    %145 = vector.load %arg17[%c0_68, %c0_69] : memref<64x176xf32, #tpu.memory_space<vmem>>, vector<64x176xf32>
    tpu.vector_store %arg17[%c0_68, %c0_69], %144 {strides = array<i32>} : memref<64x176xf32, #tpu.memory_space<vmem>>, vector<64x176xf32>,
    return
  }
}

</mosaic_0001>

<bundles_post_ra>
// kernel: ae_forward.1
= control target key start
LH: loop header
LB: loop body
LE: loop exit
PB: predicated region body
PF: predicated region fallthrough
CT: control target
= control target key end

     0   :  { %s2519_s0 = inlined_call_operand.vmem [shape: f32[64,176], index: 0, kind: input, shape index: {}]   ;;  %s2520_s1 = inlined_call_operand.vmem [shape: bf16[176,128], index: 1, kind: input, shape index: {}]   ;;  %s2521_s2 = inlined_call_operand.vmem [shape: f32[1,128], index: 2, kind: input, shape index: {}]   ;;  %s2522_s3 = inlined_call_operand.vmem [shape: f32[1,128], index: 3, kind: input, shape index: {}]   ;;  %s2523_s4 = inlined_call_operand.vmem [shape: bf16[128,64], index: 4, kind: input, shape index: {}]   ;;  %s2524_s5 = inlined_call_operand.vmem [shape: f32[1,64], index: 5, kind: input, shape index: {}]   ;;  %s2525_s6 = inlined_call_operand.vmem [shape: f32[1,64], index: 6, kind: input, shape index: {}]   ;;  %s2526_s7 = inlined_call_operand.vmem [shape: bf16[64,16], index: 7, kind: input, shape index: {}]   ;;  %s2527_s8 = inlined_call_operand.vmem [shape: f32[1,16], index: 8, kind: input, shape index: {}]   ;;  %s2528_s9 = inlined_call_operand.vmem [shape: bf16[64,64], index: 9, kind: input, shape index: {}]   ;;  %s2529_s10 = inlined_call_operand.vmem [shape: f32[1,64], index: 10, kind: input, shape index: {}]   ;;  %s2530_s11 = inlined_call_operand.vmem [shape: f32[1,64], index: 11, kind: input, shape index: {}]   ;;  %s2531_s12 = inlined_call_operand.vmem [shape: bf16[64,128], index: 12, kind: input, shape index: {}]   ;;  %s2532_s13 = inlined_call_operand.vmem [shape: f32[1,128], index: 13, kind: input, shape index: {}]   ;;  %s2533_s14 = inlined_call_operand.vmem [shape: f32[1,128], index: 14, kind: input, shape index: {}]   ;;  %s2534_s15 = inlined_call_operand.vmem [shape: bf16[128,176], index: 15, kind: input, shape index: {}]   ;;  %s2535_s16 = inlined_call_operand.vmem [shape: f32[1,176], index: 16, kind: input, shape index: {}]   ;;  %s2536_s17 = inlined_call_operand.hbm [shape: f32[64,176], index: 17, kind: output, shape index: {0}]   ;;  %s2537_s18 = inlined_call_operand.vmem [shape: f32[64,16], index: 18, kind: output, shape index: {1}]  }
   0x1   :  { %2540 = sst [smem:[#allocation5_spill]] %s2519_s0 }
   0x2   :  { %2541 = sst [smem:[#allocation6_spill]] %s2520_s1 }
   0x3   :  { %2542 = sst [smem:[#allocation7_spill]] %s2521_s2 }
   0x4   :  { %s2543_s29 = sld [smem:[#allocation6_spill]]  ;;  %v1876_v1 = vmov 0   ;;  %s2544_s23 = sld [smem:[#allocation5_spill]]  ;;  %vm172_vm0 = vcmask 392192  }
   0x5   :  { %185 = vmatprep.subr.bf16.mxu0 %v1876_v1 }
   0xa   :  { %v1661_v0 = vld [vmem:[%s2543_s29] sm:$0xff]   ;;  %v1662_v2 = vld [vmem:[%s2543_s29 + $0x8] sm:$0xff]   ;;  %v1663_v3 = vld [vmem:[%s2543_s29 + $0x10] sm:$0xff]  }
   0xb   :  { %186 = vmatpush1.bf16.msra.mxu0 %v1661_v0  ;;  %v1664_v4 = vld [vmem:[%s2543_s29 + $0x18] sm:$0xff]   ;;  %v61_v5 = vld [vmem:[%s2544_s23 + $0x8] sm:$0xff]  ;;  %v1665_v8 = vld [vmem:[%s2543_s29 + $0x20] sm:$0xff]  }
   0xc   :  { %187 = vmatprep.subr.bf16.mxu0 %v1876_v1  ;;  %v63_v6 = vld [vmem:[%s2544_s23 + $0x18] sm:$0xff]  ;;  %v1666_v9 = vld [vmem:[%s2543_s29 + $0x28] sm:$0xff]   ;;  %v1667_v10 = vld [vmem:[%s2543_s29 + $0x30] sm:$0xff]  }
   0xd   :  { %v77_v7 = vpack.c.bf16 %v63_v6, %v61_v5  ;;  %v1668_v11 = vld [vmem:[%s2543_s29 + $0x38] sm:$0xff]   ;;  %v1669_v12 = vld [vmem:[%s2543_s29 + $0x40] sm:$0xff]   ;;  %v1670_v13 = vld [vmem:[%s2543_s29 + $0x48] sm:$0xff]  }
   0xf   :  { %188 = vmatpush1.bf16.msra.mxu0 %v1662_v2  ;;  %1496 = vmatprep.mubr.msk.bf16.mxu0 %vm172_vm0, %v77_v7 }
  0x10   :  { %189 = vmatprep.subr.bf16.mxu0 %v1876_v1 }
  0x13   :  { %190 = vmatpush1.bf16.msra.mxu0 %v1663_v3 }
  0x14   :  { %191 = vmatprep.subr.bf16.mxu0 %v1876_v1 }
  0x17   :  { %192 = vmatpush1.bf16.msra.mxu0 %v1664_v4 }
  0x18   :  { %193 = vmatprep.subr.bf16.mxu0 %v1876_v1 }
  0x1b   :  { %194 = vmatpush1.bf16.msra.mxu0 %v1665_v8 }
  0x1c   :  { %195 = vmatprep.subr.bf16.mxu0 %v1876_v1 }
  0x1f   :  { %196 = vmatpush1.bf16.msra.mxu0 %v1666_v9 }
  0x20   :  { %197 = vmatprep.subr.bf16.mxu0 %v1876_v1 }
  0x23   :  { %198 = vmatpush1.bf16.msra.mxu0 %v1667_v10 }
  0x24   :  { %199 = vmatprep.subr.bf16.mxu0 %v1876_v1 }
  0x27   :  { %200 = vmatpush1.bf16.msra.mxu0 %v1668_v11 }
  0x28   :  { %201 = vmatprep.subr.bf16.mxu0 %v1876_v1 }
  0x2b   :  { %202 = vmatpush1.bf16.msra.mxu0 %v1669_v12 }
  0x2c   :  { %203 = vmatprep.subr.bf16.mxu0 %v1876_v1 }
  0x2d   :  { %24 = vsyncpa [#allocation3], 0  ;;  %v1671_v14 = vld [vmem:[%s2543_s29 + $0x50] sm:$0xff]   ;;  %v60_v15 = vld [vmem:[%s2544_s23] sm:$0xff]  ;;  %s2545_s30 = sld [smem:[#allocation7_spill]]  ;;  %vm511_vm1 = vcmask 523264  }
  0x2e   :  { %v62_v16 = vld [vmem:[%s2544_s23 + $0x10] sm:$0xff]  ;;  %v65_v17 = vld [vmem:[%s2544_s23 + $0x28] sm:$0xff]  ;;  %v67_v18 = vld [vmem:[%s2544_s23 + $0x38] sm:$0xff]  ;;  %vm775_vm2 = vcmask 130048  }
  0x2f   :  { %204 = vmatpush1.bf16.msra.mxu0 %v1670_v13  ;;  %v76_v19 = vpack.c.bf16 %v62_v16, %v60_v15  ;;  %v79_v20 = vpack.c.bf16 %v67_v18, %v65_v17  ;;  %v64_v21 = vld [vmem:[%s2544_s23 + $0x20] sm:$0xff]  ;;  %v66_v22 = vld [vmem:[%s2544_s23 + $0x30] sm:$0xff]  ;;  %v69_v23 = vld [vmem:[%s2544_s23 + $0x48] sm:$0xff] }
  0x30   :  { %205 = vmatprep.subr.bf16.mxu0 %v1876_v1  ;;  %v71_v24 = vld [vmem:[%s2544_s23 + $0x58] sm:$0xff]  ;;  %v78_v25 = vpack.c.bf16 %v66_v22, %v64_v21  ;;  %v68_v27 = vld [vmem:[%s2544_s23 + $0x40] sm:$0xff]  ;;  %v70_v28 = vld [vmem:[%s2544_s23 + $0x50] sm:$0xff] }
  0x31   :  { %v81_v26 = vpack.c.bf16 %v71_v24, %v69_v23  ;;  %v73_v29 = vld [vmem:[%s2544_s23 + $0x68] sm:$0xff]  ;;  %v75_v30 = vld [vmem:[%s2544_s23 + $0x78] sm:$0xff]  ;;  %v80_v31 = vpack.c.bf16 %v70_v28, %v68_v27  ;;  %v72_v33 = vld [vmem:[%s2544_s23 + $0x60] sm:$0xff] }
  0x32   :  { %v83_v32 = vpack.c.bf16 %v75_v30, %v73_v29  ;;  %v74_v34 = vld [vmem:[%s2544_s23 + $0x70] sm:$0xff]  ;;  %v1672_v36 = vld [vmem:[%s2523_s4] sm:$0xff]   ;;  %v1673_v37 = vld [vmem:[%s2523_s4 + $0x8] sm:$0xff]  }
  0x33   :  { %206 = vmatpush1.bf16.msra.mxu0 %v1671_v14  ;;  %v82_v35 = vpack.c.bf16 %v74_v34, %v72_v33  ;;  %v1674_v38 = vld [vmem:[%s2523_s4 + $0x10] sm:$0xff]   ;;  %v1675_v39 = vld [vmem:[%s2523_s4 + $0x18] sm:$0xff]   ;;  %v1676_v40 = vld [vmem:[%s2523_s4 + $0x20] sm:$0xff]  }
  0x34   :  { %1585 = vmatprep.subr.bf16.mxu0 %v1672_v36  ;;  %v1677_v41 = vld [vmem:[%s2523_s4 + $0x28] sm:$0xff]   ;;  %v1678_v42 = vld [vmem:[%s2523_s4 + $0x30] sm:$0xff]   ;;  %v1679_v43 = vld [vmem:[%s2523_s4 + $0x38] sm:$0xff]  }
  0x36   :  { %218 = vmatmul.mubr.bf16.vlgmr.msra.gmra.mrb[0].mxu0 %v76_v19 }
  0x37   :  { %1497 = vmatprep.mubr.msk.bf16.mxu0 %vm172_vm0, %v79_v20  ;;  %1586 = vmatpush3.bf16.msra.mxu0 %v1672_v36 }
  0x38   :  { %1587 = vmatprep.subr.bf16.mxu0 %v1673_v37 }
  0x3b   :  { %1588 = vmatpush3.bf16.msra.mxu0 %v1673_v37 }
  0x3c   :  { %1589 = vmatprep.subr.bf16.mxu0 %v1674_v38 }
  0x3e   :  { %226 = vmatmul.mubr.bf16.gmra.mrb[4].mxu0 %v78_v25 }
  0x3f   :  { %1498 = vmatprep.mubr.msk.bf16.mxu0 %vm172_vm0, %v81_v26  ;;  %1590 = vmatpush3.bf16.msra.mxu0 %v1674_v38 }
  0x40   :  { %1591 = vmatprep.subr.bf16.mxu0 %v1675_v39 }
  0x43   :  { %1592 = vmatpush3.bf16.msra.mxu0 %v1675_v39 }
  0x44   :  { %1593 = vmatprep.subr.bf16.mxu0 %v1676_v40 }
  0x46   :  { %234 = vmatmul.mubr.bf16.gmra.mrb[8].mxu0 %v80_v31 }
  0x47   :  { %1499 = vmatprep.mubr.msk.bf16.mxu0 %vm172_vm0, %v83_v32  ;;  %1594 = vmatpush3.bf16.msra.mxu0 %v1676_v40 }
  0x48   :  { %1595 = vmatprep.subr.bf16.mxu0 %v1677_v41 }
  0x4b   :  { %1596 = vmatpush3.bf16.msra.mxu0 %v1677_v41 }
  0x4c   :  { %1597 = vmatprep.subr.bf16.mxu0 %v1678_v42 }
  0x4e   :  { %242 = vmatmul.mubr.bf16.gmra.mrb[12].mxu0 %v82_v35 }
  0x4f   :  { %1598 = vmatpush3.bf16.msra.mxu0 %v1678_v42  ;;  %v303_v42 = vlaneseq }
  0x50   :  { %1599 = vmatprep.subr.bf16.mxu0 %v1679_v43 }
  0x53   :  { %1600 = vmatpush3.bf16.msra.mxu0 %v1679_v43  ;;  %v2123_v43 = vshrl.u32 %v303_v42, 7 }
 0x109   :  { %v2095_v44 = vpop.f32.mrb[0].mxu0 }
 0x10a   :  { %v221_v45 = vpop.f32.mrb[1].mxu0 }
 0x10b   :  { %v2097_v46 = vpop.f32.mrb[2].mxu0  ;;  %v295_v45 = vld [vmem:[%s2545_s30] sm:$0x1] }
 0x10c   :  { %v250_v47 = vadd.f32 %v2097_v46, %v2095_v44  ;;  %v224_v48 = vpop.f32.mrb[3].mxu0 }
 0x111   :  { %v2101_v49 = vpop.f32.mrb[4].mxu0 }
 0x112   :  { %v251_v50 = vadd.f32 %v250_v47, %v2101_v49  ;;  %v229_v51 = vpop.f32.mrb[5].mxu0  ;;  %v2129_v47 = vsub.s32 0, %v2123_v43 }
 0x113   :  { %v2104_v52 = vpop.f32.mrb[6].mxu0  ;;  %v299_v51 = vld [vmem:[%s2522_s3] sm:$0x1] }
 0x114   :  { %v252_v53 = vadd.f32 %v251_v50, %v2104_v52  ;;  %v232_v54 = vpop.f32.mrb[7].mxu0 }
 0x119   :  { %v2107_v55 = vpop.f32.mrb[8].mxu0 }
 0x11a   :  { %v253_v56 = vadd.f32 %v252_v53, %v2107_v55  ;;  %v237_v57 = vpop.f32.mrb[9].mxu0 }
 0x11b   :  { %v2110_v58 = vpop.f32.mrb[10].mxu0 }
 0x11c   :  { %v254_v59 = vadd.f32 %v253_v56, %v2110_v58  ;;  %v240_v60 = vpop.f32.mrb[11].mxu0 }
 0x121   :  { %v2113_v61 = vpop.f32.mrb[12].mxu0 }
 0x122   :  { %v255_v62 = vadd.f32 %v254_v59, %v2113_v61  ;;  %v245_v63 = vpop.f32.mrb[13].mxu0 }
 0x123   :  { %v246_v0 = vpop.f32.mrb[14].mxu0 }
 0x124   :  { %v256_v2 = vadd.f32 %v255_v62, %v246_v0  ;;  %v248_v3 = vpop.f32.mrb[15].mxu0 }
 0x126   :  { %v257_v4 = vrot.slane %v256_v2, 4 }
 0x128   :  { %v258_v5 = vadd.f32 %v257_v4, %v256_v2 }
 0x12a   :  { %v259_v6 = vrot.slane %v258_v5, 2 }
 0x12c   :  { %v260_v7 = vadd.f32 %v259_v6, %v258_v5 }
 0x12e   :  { %v261_v8 = vrot.slane %v260_v7, 1 }
 0x130   :  { %v262_v9 = vadd.f32 %v261_v8, %v260_v7 }
 0x132   :  { %v264_v10 = vmul.f32 0.015625, %v262_v9 }
 0x134   :  { %v265_v11 = vsub.f32 %v2095_v44, %v264_v10  ;;  %v266_v12 = vsub.f32 %v2097_v46, %v264_v10  ;;  %v267_v13 = vsub.f32 %v2101_v49, %v264_v10  ;;  %v268_v14 = vsub.f32 %v2104_v52, %v264_v10 }
 0x135   :  { %v269_v15 = vsub.f32 %v2107_v55, %v264_v10  ;;  %v270_v16 = vsub.f32 %v2110_v58, %v264_v10  ;;  %v271_v17 = vsub.f32 %v2113_v61, %v264_v10  ;;  %v272_v18 = vsub.f32 %v246_v0, %v264_v10 }
 0x136   :  { %v273_v19 = vmul.f32 %v265_v11, %v265_v11  ;;  %v274_v20 = vmul.f32 %v266_v12, %v266_v12  ;;  %v275_v21 = vmul.f32 %v267_v13, %v267_v13  ;;  %v276_v23 = vmul.f32 %v268_v14, %v268_v14 }
 0x137   :  { %v277_v25 = vmul.f32 %v269_v15, %v269_v15  ;;  %v278_v27 = vmul.f32 %v270_v16, %v270_v16  ;;  %v279_v29 = vmul.f32 %v271_v17, %v271_v17  ;;  %v280_v31 = vmul.f32 %v272_v18, %v272_v18 }
 0x138   :  { %v281_v22 = vadd.f32 %v274_v20, %v273_v19 }
 0x13a   :  { %v282_v24 = vadd.f32 %v281_v22, %v275_v21 }
 0x13c   :  { %v283_v26 = vadd.f32 %v282_v24, %v276_v23 }
 0x13e   :  { %v284_v28 = vadd.f32 %v283_v26, %v277_v25 }
 0x140   :  { %v285_v30 = vadd.f32 %v284_v28, %v278_v27 }
 0x142   :  { %v286_v32 = vadd.f32 %v285_v30, %v279_v29 }
 0x144   :  { %v287_v33 = vadd.f32 %v286_v32, %v280_v31 }
 0x146   :  { %v288_v34 = vrot.slane %v287_v33, 4 }
 0x148   :  { %v289_v35 = vadd.f32 %v288_v34, %v287_v33 }
 0x14a   :  { %v290_v36 = vrot.slane %v289_v35, 2 }
 0x14c   :  { %v291_v37 = vadd.f32 %v290_v36, %v289_v35 }
 0x14e   :  { %v292_v38 = vrot.slane %v291_v37, 1 }
 0x150   :  { %v293_v39 = vadd.f32 %v292_v38, %v291_v37 }
 0x152   :  { %v294_v40 = vmul.f32 0.015625, %v293_v39 }
 0x154   :  { %v296_v41 = vadd.f32 1e-05, %v294_v40 }
 0x156   :  { %1716 = vrsqrt.f32 %v296_v41 }
 0x160   :  { %v1717_v48 = vpop.eup %1716 }
 0x161   :  { %v298_v50 = vmul.f32 %v1717_v48, %v295_v45 }
 0x163   :  { %v300_v53 = vmul.f32 %v298_v50, %v264_v10  ;;  %v306_v54 = vrot.slane %v298_v50, %v2129_v47 }
 0x165   :  { %v301_v56 = vsub.f32 %v299_v51, %v300_v53  ;;  %v315_v57 = vmul.f32 %v306_v54, %v246_v0  ;;  %v308_v59 = vmul.f32 %v306_v54, %v2095_v44  ;;  %v309_v60 = vmul.f32 %v306_v54, %v2097_v46 }
 0x166   :  { %v310_v62 = vmul.f32 %v306_v54, %v2101_v49  ;;  %v311_v63 = vmul.f32 %v306_v54, %v2104_v52  ;;  %v312_v2 = vmul.f32 %v306_v54, %v2107_v55  ;;  %v313_v3 = vmul.f32 %v306_v54, %v2110_v58 }
 0x167   :  { %v320_v4 = vrot.slane %v301_v56, %v2129_v47  ;;  %v314_v5 = vmul.f32 %v306_v54, %v2113_v61 }
 0x169   :  { %v2143_v6 = vadd.f32 %v320_v4, %v315_v57  ;;  %v322_v7 = vadd.f32 %v320_v4, %v308_v59  ;;  %v323_v0 = vadd.f32 %v320_v4, %v309_v60  ;;  %v324_v8 = vadd.f32 %v320_v4, %v310_v62 }
 0x16a   :  { %v325_v44 = vadd.f32 %v320_v4, %v311_v63  ;;  %v2145_v9 = vadd.f32 %v320_v4, %v312_v2  ;;  %v2147_v46 = vadd.f32 %v320_v4, %v313_v3  ;;  %v2149_v49 = vadd.f32 %v320_v4, %v314_v5  ;;  %v1680_v5 = vld [vmem:[%s2526_s7] sm:$0xff]  }
 0x16b   :  { %v337_v52 = vsub.f32 0.0, %v2143_v6  ;;  %v330_v55 = vsub.f32 0.0, %v322_v7  ;;  %v331_v58 = vsub.f32 0.0, %v323_v0  ;;  %v332_v10 = vsub.f32 0.0, %v324_v8  ;;  %1609 = vmatprep.subr.bf16.mxu1 %v1680_v5 }
 0x16c   :  { %v333_v11 = vsub.f32 0.0, %v325_v44  ;;  %v334_v61 = vsub.f32 0.0, %v2145_v9  ;;  %v335_v12 = vsub.f32 0.0, %v2147_v46  ;;  %v336_v17 = vsub.f32 0.0, %v2149_v49  ;;  %1610 = vmatpush3.bf16.msra.mxu1 %v1680_v5 }
 0x16d   :  { %v352_v13 = vmul.f32 1.442695, %v337_v52  ;;  %v338_v14 = vmul.f32 1.442695, %v330_v55  ;;  %v340_v15 = vmul.f32 1.442695, %v331_v58 }
 0x16e   :  { %v342_v16 = vmul.f32 1.442695, %v332_v10  ;;  %v344_v18 = vmul.f32 1.442695, %v333_v11  ;;  %v346_v19 = vmul.f32 1.442695, %v334_v61 }
 0x16f   :  { %1718 = vpow2.f32 %v352_v13  ;;  %v348_v20 = vmul.f32 1.442695, %v335_v12  ;;  %v350_v21 = vmul.f32 1.442695, %v336_v17 }
 0x170   :  { %1720 = vpow2.f32 %v338_v14 }
 0x171   :  { %1722 = vpow2.f32 %v340_v15 }
 0x172   :  { %1724 = vpow2.f32 %v342_v16 }
 0x173   :  { %1726 = vpow2.f32 %v344_v18 }
 0x174   :  { %1728 = vpow2.f32 %v346_v19 }
 0x175   :  { %1730 = vpow2.f32 %v348_v20 }
 0x176   :  { %1732 = vpow2.f32 %v350_v21 }
 0x179   :  { %v1719_v22 = vpop.eup %1718 }
 0x17a   :  { %v1721_v23 = vpop.eup %1720  ;;  %v361_v24 = vadd.f32 1.0, %v1719_v22 }
 0x17b   :  { %v1723_v25 = vpop.eup %1722  ;;  %v354_v26 = vadd.f32 1.0, %v1721_v23 }
 0x17c   :  { %v1725_v27 = vpop.eup %1724  ;;  %1734 = vrcp.f32 %v361_v24  ;;  %v355_v28 = vadd.f32 1.0, %v1723_v25 }
 0x17d   :  { %v1727_v29 = vpop.eup %1726  ;;  %1736 = vrcp.f32 %v354_v26  ;;  %v356_v30 = vadd.f32 1.0, %v1725_v27 }
 0x17e   :  { %v1729_v31 = vpop.eup %1728  ;;  %1738 = vrcp.f32 %v355_v28  ;;  %v357_v32 = vadd.f32 1.0, %v1727_v29 }
 0x17f   :  { %v1731_v33 = vpop.eup %1730  ;;  %1740 = vrcp.f32 %v356_v30  ;;  %v358_v34 = vadd.f32 1.0, %v1729_v31 }
 0x180   :  { %v1733_v35 = vpop.eup %1732  ;;  %1742 = vrcp.f32 %v357_v32  ;;  %v359_v36 = vadd.f32 1.0, %v1731_v33 }
 0x181   :  { %1744 = vrcp.f32 %v358_v34  ;;  %v360_v37 = vadd.f32 1.0, %v1733_v35 }
 0x182   :  { %1746 = vrcp.f32 %v359_v36 }
 0x183   :  { %1748 = vrcp.f32 %v360_v37 }
 0x186   :  { %v1735_v38 = vpop.eup %1734 }
 0x187   :  { %v1737_v39 = vpop.eup %1736  ;;  %v377_v59 = vmul.f32 %v1735_v38, %v2143_v6  ;;  %v1681_v6 = vld [vmem:[%s2526_s7 + $0x8] sm:$0xff]  }
 0x188   :  { %v1739_v40 = vpop.eup %1738  ;;  %v370_v41 = vmul.f32 %v1737_v39, %v322_v7  ;;  %1611 = vmatprep.subr.bf16.mxu1 %v1681_v6  ;;  %v1682_v7 = vld [vmem:[%s2526_s7 + $0x10] sm:$0xff]  }
 0x189   :  { %v1741_v42 = vpop.eup %1740  ;;  %v371_v45 = vmul.f32 %v1739_v40, %v323_v0  ;;  %1612 = vmatpush3.bf16.msra.mxu1 %v1681_v6  ;;  %v1683_v0 = vld [vmem:[%s2526_s7 + $0x18] sm:$0xff]  }
 0x18a   :  { %v1743_v48 = vpop.eup %1742  ;;  %v372_v50 = vmul.f32 %v1741_v42, %v324_v8  ;;  %1613 = vmatprep.subr.bf16.mxu1 %v1682_v7  ;;  %v2174_v8 = vld [vmem:[%s2528_s9] sm:$0xff]  }
 0x18b   :  { %v1745_v51 = vpop.eup %1744  ;;  %v378_v53 = vpack.c.bf16 %v371_v45, %v370_v41  ;;  %v373_v54 = vmul.f32 %v1743_v48, %v325_v44 }
 0x18c   :  { %v1747_v56 = vpop.eup %1746  ;;  %v374_v57 = vmul.f32 %v1745_v51, %v2145_v9 }
 0x18d   :  { %v1749_v60 = vpop.eup %1748  ;;  %1601 = vmatprep.mubr.bf16.mxu0 %v378_v53  ;;  %v379_v62 = vpack.c.bf16 %v373_v54, %v372_v50  ;;  %v375_v63 = vmul.f32 %v1747_v56, %v2147_v46  ;;  %1614 = vmatpush3.bf16.msra.mxu1 %v1682_v7 }
 0x18e   :  { %v376_v2 = vmul.f32 %v1749_v60, %v2149_v49  ;;  %1615 = vmatprep.subr.bf16.mxu1 %v1683_v0 }
 0x18f   :  { %1602 = vmatmul.mubr.bf16.vlgmr.msra.gmra.mrb[16].mxu0 %v379_v62  ;;  %v380_v3 = vpack.c.bf16 %v375_v63, %v374_v57 }
 0x190   :  { %v381_v4 = vpack.c.bf16 %v377_v59, %v376_v2 }
 0x191   :  { %1605 = vmatprep.mubr.bf16.mxu0 %v380_v3  ;;  %1616 = vmatpush3.bf16.msra.mxu1 %v1683_v0 }
 0x192   :  { %1625 = vmatprep.subr.bf16.mxu1 %v2174_v8 }
 0x197   :  { %1606 = vmatmul.mubr.bf16.gmra.mrb[20].mxu0 %v381_v4 }
 0x262   :  { %v2177_v44 = vpop.f32.mrb[16].mxu0 }
 0x263   :  { %v2179_v9 = vpop.f32.mrb[17].mxu0  ;;  %v515_v10 = vsel %vm511_vm1, %v2177_v44, 0.0 }
 0x264   :  { %v2181_v46 = vpop.f32.mrb[18].mxu0  ;;  %v512_v52 = vsel %vm511_vm1, %v2179_v9, 0.0 }
 0x265   :  { %v2183_v49 = vpop.f32.mrb[19].mxu0  ;;  %v517_v61 = vsel %vm511_vm1, %v2181_v46, 0.0 }
 0x266   :  { %v513_v55 = vsel %vm511_vm1, %v2183_v49, 0.0 }
 0x267   :  { %v514_v58 = vadd.f32 %v513_v55, %v512_v52 }
 0x269   :  { %v516_v11 = vadd.f32 %v515_v10, %v514_v58 }
 0x26a   :  { %v2193_v12 = vpop.f32.mrb[20].mxu0 }
 0x26b   :  { %v2195_v13 = vpop.f32.mrb[21].mxu0  ;;  %v518_v14 = vadd.f32 %v517_v61, %v516_v11  ;;  %v523_v21 = vsel %vm511_vm1, %v2193_v12, 0.0 }
 0x26c   :  { %v519_v15 = vsel %vm511_vm1, %v2195_v13, 0.0  ;;  %v2199_v16 = vpop.f32.mrb[22].mxu0 }
 0x26d   :  { %v520_v17 = vadd.f32 %v519_v15, %v518_v14  ;;  %v499_v18 = vpop.f32.mrb[23].mxu0  ;;  %v525_v23 = vsel %vm511_vm1, %v2199_v16, 0.0 }
 0x26e   :  { %v521_v19 = vsel %vm511_vm1, %v499_v18, 0.0 }
 0x26f   :  { %v522_v20 = vadd.f32 %v521_v19, %v520_v17  ;;  %v572_v19 = vld [vmem:[%s2524_s5] sm:$0x1] }
 0x271   :  { %v524_v22 = vadd.f32 %v523_v21, %v522_v20 }
 0x273   :  { %v526_v24 = vadd.f32 %v525_v23, %v524_v22  ;;  %v576_v22 = vld [vmem:[%s2525_s6] sm:$0x1] }
 0x275   :  { %v527_v25 = vrot.slane %v526_v24, 4 }
 0x277   :  { %v528_v26 = vadd.f32 %v527_v25, %v526_v24 }
 0x279   :  { %v529_v27 = vrot.slane %v528_v26, 2 }
 0x27b   :  { %v530_v28 = vadd.f32 %v529_v27, %v528_v26 }
 0x27d   :  { %v531_v29 = vrot.slane %v530_v28, 1 }
 0x27f   :  { %v532_v30 = vadd.f32 %v531_v29, %v530_v28 }
 0x281   :  { %v533_v31 = vmul.f32 0.015625, %v532_v30 }
 0x283   :  { %v534_v32 = vsub.f32 %v2179_v9, %v533_v31  ;;  %v535_v33 = vsub.f32 %v2183_v49, %v533_v31  ;;  %v536_v34 = vsub.f32 %v2177_v44, %v533_v31  ;;  %v537_v35 = vsub.f32 %v2181_v46, %v533_v31 }
 0x284   :  { %v538_v36 = vsub.f32 %v2195_v13, %v533_v31  ;;  %v539_v37 = vsub.f32 %v499_v18, %v533_v31  ;;  %v540_v38 = vsub.f32 %v2193_v12, %v533_v31  ;;  %v541_v39 = vsub.f32 %v2199_v16, %v533_v31 }
 0x285   :  { %v542_v40 = vmul.f32 %v534_v32, %v534_v32  ;;  %v543_v41 = vmul.f32 %v535_v33, %v535_v33  ;;  %v544_v42 = vmul.f32 %v536_v34, %v536_v34  ;;  %v545_v45 = vmul.f32 %v537_v35, %v537_v35 }
 0x286   :  { %v546_v53 = vmul.f32 %v538_v36, %v538_v36  ;;  %v547_v57 = vmul.f32 %v539_v37, %v539_v37  ;;  %v548_v62 = vmul.f32 %v540_v38, %v540_v38  ;;  %v549_v3 = vmul.f32 %v541_v39, %v541_v39 }
 0x287   :  { %v550_v48 = vsel %vm511_vm1, %v542_v40, 0.0  ;;  %v551_v50 = vsel %vm511_vm1, %v543_v41, 0.0  ;;  %v553_v54 = vsel %vm511_vm1, %v544_v42, 0.0  ;;  %v555_v59 = vsel %vm511_vm1, %v545_v45, 0.0 }
 0x288   :  { %v552_v51 = vadd.f32 %v551_v50, %v550_v48  ;;  %v557_v63 = vsel %vm511_vm1, %v546_v53, 0.0  ;;  %v559_v4 = vsel %vm511_vm1, %v547_v57, 0.0  ;;  %v561_v6 = vsel %vm511_vm1, %v548_v62, 0.0 }
 0x289   :  { %v563_v0 = vsel %vm511_vm1, %v549_v3, 0.0 }
 0x28a   :  { %v554_v56 = vadd.f32 %v553_v54, %v552_v51 }
 0x28c   :  { %v556_v60 = vadd.f32 %v555_v59, %v554_v56 }
 0x28e   :  { %v558_v2 = vadd.f32 %v557_v63, %v556_v60 }
 0x290   :  { %v560_v5 = vadd.f32 %v559_v4, %v558_v2 }
 0x292   :  { %v562_v7 = vadd.f32 %v561_v6, %v560_v5 }
 0x294   :  { %v564_v52 = vadd.f32 %v563_v0, %v562_v7 }
 0x296   :  { %v565_v55 = vrot.slane %v564_v52, 4 }
 0x298   :  { %v566_v58 = vadd.f32 %v565_v55, %v564_v52 }
 0x29a   :  { %v567_v10 = vrot.slane %v566_v58, 2 }
 0x29c   :  { %v568_v11 = vadd.f32 %v567_v10, %v566_v58 }
 0x29e   :  { %v569_v61 = vrot.slane %v568_v11, 1 }
 0x2a0   :  { %v570_v14 = vadd.f32 %v569_v61, %v568_v11 }
 0x2a2   :  { %v571_v15 = vmul.f32 0.015625, %v570_v14 }
 0x2a4   :  { %v573_v17 = vadd.f32 1e-05, %v571_v15 }
 0x2a6   :  { %1750 = vrsqrt.f32 %v573_v17 }
 0x2b0   :  { %v1751_v20 = vpop.eup %1750 }
 0x2b1   :  { %v575_v21 = vmul.f32 %v1751_v20, %v572_v19 }
 0x2b3   :  { %v577_v23 = vmul.f32 %v575_v21, %v533_v31  ;;  %v583_v24 = vrot.slane %v575_v21, %v2129_v47 }
 0x2b5   :  { %v578_v25 = vsub.f32 %v576_v22, %v577_v23  ;;  %v590_v26 = vmul.f32 %v583_v24, %v499_v18  ;;  %v585_v27 = vmul.f32 %v583_v24, %v2179_v9  ;;  %v586_v28 = vmul.f32 %v583_v24, %v2183_v49 }
 0x2b6   :  { %v587_v29 = vmul.f32 %v2177_v44, %v583_v24  ;;  %v588_v30 = vmul.f32 %v2181_v46, %v583_v24  ;;  %v589_v32 = vmul.f32 %v583_v24, %v2195_v13  ;;  %v591_v33 = vmul.f32 %v2193_v12, %v583_v24 }
 0x2b7   :  { %v597_v34 = vrot.slane %v578_v25, %v2129_v47  ;;  %v592_v31 = vmul.f32 %v2199_v16, %v583_v24 }
 0x2b9   :  { %v2236_v35 = vadd.f32 %v597_v34, %v590_v26  ;;  %v599_v36 = vadd.f32 %v597_v34, %v585_v27  ;;  %v600_v18 = vadd.f32 %v597_v34, %v586_v28  ;;  %v601_v37 = vadd.f32 %v597_v34, %v587_v29 }
 0x2ba   :  { %v2238_v9 = vadd.f32 %v597_v34, %v588_v30  ;;  %v2240_v49 = vadd.f32 %v597_v34, %v589_v32  ;;  %v2242_v44 = vadd.f32 %v597_v34, %v591_v33  ;;  %v2244_v46 = vadd.f32 %v597_v34, %v592_v31  ;;  %v1685_v32 = vld [vmem:[%s2528_s9 + $0x8] sm:$0xff]  }
 0x2bb   :  { %v612_v13 = vsub.f32 0.0, %v2236_v35  ;;  %v607_v12 = vsub.f32 0.0, %v599_v36  ;;  %v608_v38 = vsub.f32 0.0, %v600_v18  ;;  %v609_v39 = vsub.f32 0.0, %v601_v37 }
 0x2bc   :  { %v610_v16 = vsub.f32 0.0, %v2238_v9  ;;  %v611_v40 = vsub.f32 0.0, %v2240_v49  ;;  %v613_v41 = vsub.f32 0.0, %v2242_v44  ;;  %v614_v51 = vsub.f32 0.0, %v2244_v46 }
 0x2bd   :  { %v625_v42 = vmul.f32 1.442695, %v612_v13  ;;  %v615_v45 = vmul.f32 1.442695, %v607_v12  ;;  %v617_v48 = vmul.f32 1.442695, %v608_v38 }
 0x2be   :  { %v619_v50 = vmul.f32 1.442695, %v609_v39  ;;  %v621_v53 = vmul.f32 1.442695, %v610_v16  ;;  %v623_v54 = vmul.f32 1.442695, %v611_v40 }
 0x2bf   :  { %1752 = vpow2.f32 %v625_v42  ;;  %v627_v56 = vmul.f32 1.442695, %v613_v41  ;;  %v629_v57 = vmul.f32 1.442695, %v614_v51  ;;  %v1690_v40 = vld [vmem:[%s2531_s12 + $0x10] sm:$0xff]   ;;  %v1691_v41 = vld [vmem:[%s2531_s12 + $0x18] sm:$0xff]  }
 0x2c0   :  { %1754 = vpow2.f32 %v615_v45 }
 0x2c1   :  { %1756 = vpow2.f32 %v617_v48 }
 0x2c2   :  { %1758 = vpow2.f32 %v619_v50 }
 0x2c3   :  { %1760 = vpow2.f32 %v621_v53 }
 0x2c4   :  { %1762 = vpow2.f32 %v623_v54 }
 0x2c5   :  { %1764 = vpow2.f32 %v627_v56 }
 0x2c6   :  { %1766 = vpow2.f32 %v629_v57 }
 0x2c9   :  { %v1753_v59 = vpop.eup %1752 }
 0x2ca   :  { %v1755_v60 = vpop.eup %1754  ;;  %v636_v62 = vadd.f32 1.0, %v1753_v59 }
 0x2cb   :  { %v1757_v63 = vpop.eup %1756  ;;  %v631_v2 = vadd.f32 1.0, %v1755_v60 }
 0x2cc   :  { %v1759_v3 = vpop.eup %1758  ;;  %1768 = vrcp.f32 %v636_v62  ;;  %v632_v4 = vadd.f32 1.0, %v1757_v63 }
 0x2cd   :  { %v1761_v5 = vpop.eup %1760  ;;  %1770 = vrcp.f32 %v631_v2  ;;  %v633_v6 = vadd.f32 1.0, %v1759_v3 }
 0x2ce   :  { %v1763_v7 = vpop.eup %1762  ;;  %1772 = vrcp.f32 %v632_v4  ;;  %v634_v0 = vadd.f32 1.0, %v1761_v5 }
 0x2cf   :  { %v1765_v52 = vpop.eup %1764  ;;  %1774 = vrcp.f32 %v633_v6  ;;  %v635_v55 = vadd.f32 1.0, %v1763_v7 }
 0x2d0   :  { %v1767_v58 = vpop.eup %1766  ;;  %1776 = vrcp.f32 %v634_v0  ;;  %v637_v10 = vadd.f32 1.0, %v1765_v52 }
 0x2d1   :  { %1778 = vrcp.f32 %v635_v55  ;;  %v638_v11 = vadd.f32 1.0, %v1767_v58 }
 0x2d2   :  { %1780 = vrcp.f32 %v637_v10 }
 0x2d3   :  { %1782 = vrcp.f32 %v638_v11 }
 0x2d6   :  { %v1769_v61 = vpop.eup %1768 }
 0x2d7   :  { %v1771_v14 = vpop.eup %1770  ;;  %v652_v22 = vmul.f32 %v1769_v61, %v2236_v35 }
 0x2d8   :  { %v1773_v15 = vpop.eup %1772  ;;  %v647_v17 = vmul.f32 %v1771_v14, %v599_v36  ;;  %v1686_v36 = vld [vmem:[%s2528_s9 + $0x10] sm:$0xff]  }
 0x2d9   :  { %v1775_v19 = vpop.eup %1774  ;;  %v648_v20 = vmul.f32 %v1773_v15, %v600_v18  ;;  %v1687_v18 = vld [vmem:[%s2528_s9 + $0x18] sm:$0xff]  }
 0x2da   :  { %v1777_v21 = vpop.eup %1776  ;;  %v649_v23 = vmul.f32 %v1775_v19, %v601_v37  ;;  %v1508_v37 = vld [vmem:[%s2527_s8] ss:$0 sm:$0xff] }
 0x2db   :  { %v1779_v24 = vpop.eup %1778  ;;  %v655_v25 = vpack.c.bf16 %v648_v20, %v647_v17  ;;  %v650_v26 = vmul.f32 %v1777_v21, %v2238_v9 }
 0x2dc   :  { %v1781_v27 = vpop.eup %1780  ;;  %v651_v28 = vmul.f32 %v1779_v24, %v2240_v49  ;;  %v1689_v49 = vld [vmem:[%s2531_s12 + $0x8] sm:$0xff]  }
 0x2dd   :  { %v1783_v29 = vpop.eup %1782  ;;  %1617 = vmatprep.mubr.msk.bf16.mxu1 %vm511_vm1, %v655_v25  ;;  %v656_v30 = vpack.c.bf16 %v650_v26, %v649_v23  ;;  %v653_v33 = vmul.f32 %v1781_v27, %v2242_v44 }
 0x2de   :  { %v657_v34 = vpack.c.bf16 %v652_v22, %v651_v28  ;;  %v654_v31 = vmul.f32 %v1783_v29, %v2244_v46 }
 0x2df   :  { %1618 = vmatmul.mubr.msk.bf16.vlgmr.msra.gmra.mrb[0].mxu1 %vm511_vm1, %v656_v30 }
 0x2e0   :  { %1626 = vmatpush3.bf16.msra.mxu1 %v2174_v8  ;;  %1621 = vmatprep.mubr.msk.bf16.mxu1 %vm511_vm1, %v657_v34  ;;  %v658_v35 = vpack.c.bf16 %v654_v31, %v653_v33  ;;  %v1688_v8 = vld [vmem:[%s2531_s12] sm:$0xff]  }
 0x2e1   :  { %1627 = vmatprep.subr.bf16.mxu1 %v1685_v32  ;;  %1641 = vmatprep.subr.bf16.mxu0 %v1688_v8 }
 0x2e2   :  { %1642 = vmatpush3.bf16.msra.mxu0 %v1688_v8 }
 0x2e3   :  { %1643 = vmatprep.subr.bf16.mxu0 %v1689_v49 }
 0x2e4   :  { %1628 = vmatpush3.bf16.msra.mxu1 %v1685_v32 }
 0x2e5   :  { %1629 = vmatprep.subr.bf16.mxu1 %v1686_v36 }
 0x2e6   :  { %1644 = vmatpush3.bf16.msra.mxu0 %v1689_v49 }
 0x2e7   :  { %1622 = vmatmul.mubr.msk.bf16.gmra.mrb[4].mxu1 %vm511_vm1, %v658_v35  ;;  %1645 = vmatprep.subr.bf16.mxu0 %v1690_v40 }
 0x2e8   :  { %1630 = vmatpush3.bf16.msra.mxu1 %v1686_v36  ;;  %1633 = vmatprep.mubr.msk.bf16.mxu1 %vm511_vm1, %v655_v25 }
 0x2e9   :  { %1631 = vmatprep.subr.bf16.mxu1 %v1687_v18 }
 0x2ea   :  { %1646 = vmatpush3.bf16.msra.mxu0 %v1690_v40 }
 0x2eb   :  { %1647 = vmatprep.subr.bf16.mxu0 %v1691_v41 }
 0x2ec   :  { %1632 = vmatpush3.bf16.msra.mxu1 %v1687_v18 }
 0x2ee   :  { %1648 = vmatpush3.bf16.msra.mxu0 %v1691_v41 }
 0x2ef   :  { %1634 = vmatmul.mubr.msk.bf16.vlgmr.msra.gmra.mrb[8].mxu1 %vm511_vm1, %v656_v30 }
 0x2f0   :  { %1637 = vmatprep.mubr.msk.bf16.mxu1 %vm511_vm1, %v657_v34 }
 0x2f7   :  { %1638 = vmatmul.mubr.msk.bf16.gmra.mrb[12].mxu1 %vm511_vm1, %v658_v35 }
 0x2f8   :  { %1408 = vmatprep.mubr.bf16.mxu1 %v1876_v1 }
 0x3b2   :  { %v1619_v9 = vpop.f32.mrb[0].mxu1 }
 0x3b3   :  { %v753_v44 = vadd.f32 %v1619_v9, %v1508_v37  ;;  %v744_v46 = vpop.f32.mrb[1].mxu1 }
 0x3b4   :  { %v745_v13 = vadd.f32 %v1508_v37, %v744_v46  ;;  %v1620_v12 = vpop.f32.mrb[2].mxu1 }
 0x3b5   :  { %778 = vst.msk [vmem:[%s2537_s18 + $0x10] sm:$0xff] %vm775_vm2, %v753_v44  ;;  %v756_v38 = vadd.f32 %v1620_v12, %v1508_v37  ;;  %v747_v39 = vpop.f32.mrb[3].mxu1 }
 0x3b6   :  { %776 = vst.msk [vmem:[%s2537_s18] sm:$0xff] %vm775_vm2, %v745_v13  ;;  %v748_v16 = vadd.f32 %v1508_v37, %v747_v39 }
 0x3b7   :  { %779 = vst.msk [vmem:[%s2537_s18 + $0x18] sm:$0xff] %vm775_vm2, %v756_v38 }
 0x3b8   :  { %777 = vst.msk [vmem:[%s2537_s18 + $0x8] sm:$0xff] %vm775_vm2, %v748_v16 }
 0x3ba   :  { %v1623_v42 = vpop.f32.mrb[4].mxu1 }
 0x3bb   :  { %v769_v45 = vadd.f32 %v1623_v42, %v1508_v37  ;;  %v760_v48 = vpop.f32.mrb[5].mxu1 }
 0x3bc   :  { %v761_v50 = vadd.f32 %v1508_v37, %v760_v48  ;;  %v1624_v51 = vpop.f32.mrb[6].mxu1 }
 0x3bd   :  { %782 = vst.msk [vmem:[%s2537_s18 + $0x30] sm:$0xff] %vm775_vm2, %v769_v45  ;;  %v772_v53 = vadd.f32 %v1624_v51, %v1508_v37  ;;  %v763_v54 = vpop.f32.mrb[7].mxu1 }
 0x3be   :  { %780 = vst.msk [vmem:[%s2537_s18 + $0x20] sm:$0xff] %vm775_vm2, %v761_v50  ;;  %v764_v56 = vadd.f32 %v1508_v37, %v763_v54 }
 0x3bf   :  { %783 = vst.msk [vmem:[%s2537_s18 + $0x38] sm:$0xff] %vm775_vm2, %v772_v53 }
 0x3c0   :  { %781 = vst.msk [vmem:[%s2537_s18 + $0x28] sm:$0xff] %vm775_vm2, %v764_v56 }
 0x3c2   :  { %v2322_v57 = vpop.f32.mrb[8].mxu1 }
 0x3c3   :  { %v2324_v59 = vpop.f32.mrb[9].mxu1  ;;  %v884_v4 = vsel %vm511_vm1, %v2322_v57, 0.0 }
 0x3c4   :  { %v2326_v60 = vpop.f32.mrb[10].mxu1  ;;  %v881_v63 = vsel %vm511_vm1, %v2324_v59, 0.0 }
 0x3c5   :  { %v2328_v62 = vpop.f32.mrb[11].mxu1  ;;  %v886_v6 = vsel %vm511_vm1, %v2326_v60, 0.0 }
 0x3c6   :  { %v882_v2 = vsel %vm511_vm1, %v2328_v62, 0.0 }
 0x3c7   :  { %v883_v3 = vadd.f32 %v882_v2, %v881_v63 }
 0x3c9   :  { %v885_v5 = vadd.f32 %v884_v4, %v883_v3 }
 0x3ca   :  { %v2338_v7 = vpop.f32.mrb[12].mxu1 }
 0x3cb   :  { %v2340_v0 = vpop.f32.mrb[13].mxu1  ;;  %v887_v52 = vadd.f32 %v886_v6, %v885_v5  ;;  %v892_v15 = vsel %vm511_vm1, %v2338_v7, 0.0 }
 0x3cc   :  { %v888_v55 = vsel %vm511_vm1, %v2340_v0, 0.0  ;;  %v2344_v58 = vpop.f32.mrb[14].mxu1 }
 0x3cd   :  { %v889_v10 = vadd.f32 %v888_v55, %v887_v52  ;;  %v869_v11 = vpop.f32.mrb[15].mxu1  ;;  %v894_v19 = vsel %vm511_vm1, %v2344_v58, 0.0 }
 0x3ce   :  { %v890_v61 = vsel %vm511_vm1, %v869_v11, 0.0 }
 0x3cf   :  { %v891_v14 = vadd.f32 %v890_v61, %v889_v10  ;;  %v941_v10 = vld [vmem:[%s2529_s10] sm:$0x1] }
 0x3d1   :  { %v893_v17 = vadd.f32 %v892_v15, %v891_v14  ;;  %v945_v15 = vld [vmem:[%s2530_s11] sm:$0x1] }
 0x3d3   :  { %v895_v20 = vadd.f32 %v894_v19, %v893_v17 }
 0x3d5   :  { %v896_v21 = vrot.slane %v895_v20, 4 }
 0x3d7   :  { %v897_v22 = vadd.f32 %v896_v21, %v895_v20 }
 0x3d9   :  { %v898_v23 = vrot.slane %v897_v22, 2 }
 0x3db   :  { %v899_v24 = vadd.f32 %v898_v23, %v897_v22 }
 0x3dd   :  { %v900_v25 = vrot.slane %v899_v24, 1 }
 0x3df   :  { %v901_v26 = vadd.f32 %v900_v25, %v899_v24 }
 0x3e1   :  { %v902_v27 = vmul.f32 0.015625, %v901_v26 }
 0x3e3   :  { %v903_v28 = vsub.f32 %v2324_v59, %v902_v27  ;;  %v904_v29 = vsub.f32 %v2328_v62, %v902_v27  ;;  %v905_v30 = vsub.f32 %v2322_v57, %v902_v27  ;;  %v906_v32 = vsub.f32 %v2326_v60, %v902_v27 }
 0x3e4   :  { %v907_v33 = vsub.f32 %v2340_v0, %v902_v27  ;;  %v908_v34 = vsub.f32 %v869_v11, %v902_v27  ;;  %v909_v31 = vsub.f32 %v2338_v7, %v902_v27  ;;  %v910_v35 = vsub.f32 %v2344_v58, %v902_v27 }
 0x3e5   :  { %v911_v36 = vmul.f32 %v903_v28, %v903_v28  ;;  %v912_v18 = vmul.f32 %v904_v29, %v904_v29  ;;  %v913_v8 = vmul.f32 %v905_v30, %v905_v30  ;;  %v914_v37 = vmul.f32 %v906_v32, %v906_v32 }
 0x3e6   :  { %v915_v46 = vmul.f32 %v907_v33, %v907_v33  ;;  %v916_v38 = vmul.f32 %v908_v34, %v908_v34  ;;  %v917_v40 = vmul.f32 %v909_v31, %v909_v31  ;;  %v918_v45 = vmul.f32 %v910_v35, %v910_v35 }
 0x3e7   :  { %v919_v9 = vsel %vm511_vm1, %v911_v36, 0.0  ;;  %v920_v49 = vsel %vm511_vm1, %v912_v18, 0.0  ;;  %v922_v13 = vsel %vm511_vm1, %v913_v8, 0.0  ;;  %v924_v39 = vsel %vm511_vm1, %v914_v37, 0.0 }
 0x3e8   :  { %v921_v44 = vadd.f32 %v920_v49, %v919_v9  ;;  %v926_v41 = vsel %vm511_vm1, %v915_v46, 0.0  ;;  %v928_v48 = vsel %vm511_vm1, %v916_v38, 0.0  ;;  %v930_v51 = vsel %vm511_vm1, %v917_v40, 0.0 }
 0x3e9   :  { %v932_v54 = vsel %vm511_vm1, %v918_v45, 0.0 }
 0x3ea   :  { %v923_v12 = vadd.f32 %v922_v13, %v921_v44 }
 0x3ec   :  { %v925_v16 = vadd.f32 %v924_v39, %v923_v12 }
 0x3ee   :  { %v927_v42 = vadd.f32 %v926_v41, %v925_v16 }
 0x3f0   :  { %v929_v50 = vadd.f32 %v928_v48, %v927_v42 }
 0x3f2   :  { %v931_v53 = vadd.f32 %v930_v51, %v929_v50 }
 0x3f4   :  { %v933_v56 = vadd.f32 %v932_v54, %v931_v53 }
 0x3f6   :  { %v934_v63 = vrot.slane %v933_v56, 4 }
 0x3f8   :  { %v935_v2 = vadd.f32 %v934_v63, %v933_v56 }
 0x3fa   :  { %v936_v3 = vrot.slane %v935_v2, 2 }
 0x3fc   :  { %v937_v4 = vadd.f32 %v936_v3, %v935_v2 }
 0x3fe   :  { %v938_v5 = vrot.slane %v937_v4, 1 }
 0x400   :  { %v939_v6 = vadd.f32 %v938_v5, %v937_v4 }
 0x402   :  { %v940_v52 = vmul.f32 0.015625, %v939_v6 }
 0x404   :  { %v942_v55 = vadd.f32 1e-05, %v940_v52 }
 0x406   :  { %1784 = vrsqrt.f32 %v942_v55 }
 0x410   :  { %v1785_v61 = vpop.eup %1784 }
 0x411   :  { %v944_v14 = vmul.f32 %v1785_v61, %v941_v10 }
 0x413   :  { %v946_v17 = vmul.f32 %v944_v14, %v902_v27  ;;  %v952_v19 = vrot.slane %v944_v14, %v2129_v47 }
 0x415   :  { %v947_v20 = vsub.f32 %v945_v15, %v946_v17  ;;  %v959_v21 = vmul.f32 %v952_v19, %v869_v11  ;;  %v954_v22 = vmul.f32 %v952_v19, %v2324_v59  ;;  %v955_v23 = vmul.f32 %v952_v19, %v2328_v62 }
 0x416   :  { %v956_v24 = vmul.f32 %v2322_v57, %v952_v19  ;;  %v957_v25 = vmul.f32 %v2326_v60, %v952_v19  ;;  %v958_v26 = vmul.f32 %v952_v19, %v2340_v0  ;;  %v960_v28 = vmul.f32 %v2338_v7, %v952_v19 }
 0x417   :  { %v966_v29 = vrot.slane %v947_v20, %v2129_v47  ;;  %v961_v27 = vmul.f32 %v2344_v58, %v952_v19 }
 0x419   :  { %v2381_v30 = vadd.f32 %v966_v29, %v959_v21  ;;  %v968_v32 = vadd.f32 %v966_v29, %v954_v22  ;;  %v969_v11 = vadd.f32 %v966_v29, %v955_v23  ;;  %v970_v33 = vadd.f32 %v966_v29, %v956_v24 }
 0x41a   :  { %v2383_v59 = vadd.f32 %v966_v29, %v957_v25  ;;  %v2385_v62 = vadd.f32 %v966_v29, %v958_v26  ;;  %v2387_v57 = vadd.f32 %v966_v29, %v960_v28  ;;  %v2389_v60 = vadd.f32 %v966_v29, %v961_v27  ;;  %v1694_v27 = vld [vmem:[%s2534_s15 + $0x4] ss:$8 sps:$4 sm:$0xff]  }
 0x41b   :  { %v981_v0 = vsub.f32 0.0, %v2381_v30  ;;  %v976_v7 = vsub.f32 0.0, %v968_v32  ;;  %v977_v34 = vsub.f32 0.0, %v969_v11  ;;  %v978_v31 = vsub.f32 0.0, %v970_v33  ;;  %1376 = vmatprep.subr.bf16.mxu1 %v1694_v27 }
 0x41c   :  { %v979_v58 = vsub.f32 0.0, %v2383_v59  ;;  %v980_v35 = vsub.f32 0.0, %v2385_v62  ;;  %v982_v36 = vsub.f32 0.0, %v2387_v57  ;;  %v983_v49 = vsub.f32 0.0, %v2389_v60 }
 0x41d   :  { %v994_v18 = vmul.f32 1.442695, %v981_v0  ;;  %v984_v8 = vmul.f32 1.442695, %v976_v7  ;;  %v986_v37 = vmul.f32 1.442695, %v977_v34 }
 0x41e   :  { %v988_v9 = vmul.f32 1.442695, %v978_v31  ;;  %v990_v44 = vmul.f32 1.442695, %v979_v58  ;;  %v992_v46 = vmul.f32 1.442695, %v980_v35 }
 0x41f   :  { %1786 = vpow2.f32 %v994_v18  ;;  %v996_v13 = vmul.f32 1.442695, %v982_v36  ;;  %v998_v12 = vmul.f32 1.442695, %v983_v49  ;;  %v1704_v0 = vld [vmem:[%s2534_s15 + $0x40] ss:$8 sps:$4 sm:$0xff]  }
 0x420   :  { %1788 = vpow2.f32 %v984_v8  ;;  %v1709_v7 = vld [vmem:[%s2534_s15 + $0x54] ss:$8 sps:$4 sm:$0xff]   ;;  %v1707_v34 = vld [vmem:[%s2534_s15 + $0x50] ss:$8 sps:$4 sm:$0xff]   ;;  %v1712_v31 = vld [vmem:[%s2534_s15 + $0x64] ss:$8 sps:$4 sm:$0xff]  }
 0x421   :  { %1790 = vpow2.f32 %v986_v37  ;;  %v1710_v58 = vld [vmem:[%s2534_s15 + $0x60] ss:$8 sps:$4 sm:$0xff]   ;;  %v1715_v35 = vld [vmem:[%s2534_s15 + $0x74] ss:$8 sps:$4 sm:$0xff]   ;;  %v1713_v36 = vld [vmem:[%s2534_s15 + $0x70] ss:$8 sps:$4 sm:$0xff]  }
 0x422   :  { %1792 = vpow2.f32 %v988_v9 }
 0x423   :  { %1794 = vpow2.f32 %v990_v44 }
 0x424   :  { %1796 = vpow2.f32 %v992_v46 }
 0x425   :  { %1798 = vpow2.f32 %v996_v13 }
 0x426   :  { %1800 = vpow2.f32 %v998_v12 }
 0x429   :  { %v1787_v38 = vpop.eup %1786 }
 0x42a   :  { %v1789_v39 = vpop.eup %1788  ;;  %v1005_v16 = vadd.f32 1.0, %v1787_v38 }
 0x42b   :  { %v1791_v40 = vpop.eup %1790  ;;  %v1000_v41 = vadd.f32 1.0, %v1789_v39 }
 0x42c   :  { %v1793_v42 = vpop.eup %1792  ;;  %1802 = vrcp.f32 %v1005_v16  ;;  %v1001_v45 = vadd.f32 1.0, %v1791_v40 }
 0x42d   :  { %v1795_v48 = vpop.eup %1794  ;;  %1804 = vrcp.f32 %v1000_v41  ;;  %v1002_v50 = vadd.f32 1.0, %v1793_v42 }
 0x42e   :  { %v1797_v51 = vpop.eup %1796  ;;  %1806 = vrcp.f32 %v1001_v45  ;;  %v1003_v53 = vadd.f32 1.0, %v1795_v48 }
 0x42f   :  { %v1799_v54 = vpop.eup %1798  ;;  %1808 = vrcp.f32 %v1002_v50  ;;  %v1004_v56 = vadd.f32 1.0, %v1797_v51 }
 0x430   :  { %v1801_v63 = vpop.eup %1800  ;;  %1810 = vrcp.f32 %v1003_v53  ;;  %v1006_v2 = vadd.f32 1.0, %v1799_v54 }
 0x431   :  { %1812 = vrcp.f32 %v1004_v56  ;;  %v1007_v3 = vadd.f32 1.0, %v1801_v63 }
 0x432   :  { %1814 = vrcp.f32 %v1006_v2 }
 0x433   :  { %1816 = vrcp.f32 %v1007_v3 }
 0x436   :  { %v1803_v4 = vpop.eup %1802 }
 0x437   :  { %v1805_v5 = vpop.eup %1804  ;;  %v1021_v14 = vmul.f32 %v1803_v4, %v2381_v30  ;;  %v1692_v30 = vld [vmem:[%s2534_s15] ss:$8 sps:$4 sm:$0xff]  }
 0x438   :  { %v1807_v6 = vpop.eup %1806  ;;  %v1016_v52 = vmul.f32 %v1805_v5, %v968_v32  ;;  %1377 = vmatpush1.bf16.msra.mxu1 %v1692_v30  ;;  %v1697_v32 = vld [vmem:[%s2534_s15 + $0x14] ss:$8 sps:$4 sm:$0xff]  }
 0x439   :  { %v1809_v55 = vpop.eup %1808  ;;  %v1017_v10 = vmul.f32 %v1807_v6, %v969_v11  ;;  %v1695_v11 = vld [vmem:[%s2534_s15 + $0x10] ss:$8 sps:$4 sm:$0xff]   ;;  %1378 = vmatprep.subr.bf16.mxu1 %v1697_v32 }
 0x43a   :  { %v1811_v61 = vpop.eup %1810  ;;  %v1018_v15 = vmul.f32 %v1809_v55, %v970_v33  ;;  %v1700_v33 = vld [vmem:[%s2534_s15 + $0x24] ss:$8 sps:$4 sm:$0xff]  }
 0x43b   :  { %v1813_v17 = vpop.eup %1812  ;;  %v1024_v19 = vpack.c.bf16 %v1017_v10, %v1016_v52  ;;  %v1019_v20 = vmul.f32 %v1811_v61, %v2383_v59  ;;  %v1698_v59 = vld [vmem:[%s2534_s15 + $0x20] ss:$8 sps:$4 sm:$0xff]  }
 0x43c   :  { %v1815_v21 = vpop.eup %1814  ;;  %v1020_v22 = vmul.f32 %v1813_v17, %v2385_v62  ;;  %1379 = vmatpush1.bf16.msra.mxu1 %v1695_v11  ;;  %v1703_v62 = vld [vmem:[%s2534_s15 + $0x34] ss:$8 sps:$4 sm:$0xff]  }
 0x43d   :  { %v1817_v23 = vpop.eup %1816  ;;  %1649 = vmatprep.mubr.msk.bf16.mxu0 %vm511_vm1, %v1024_v19  ;;  %v1025_v24 = vpack.c.bf16 %v1019_v20, %v1018_v15  ;;  %v1022_v25 = vmul.f32 %v1815_v21, %v2387_v57  ;;  %1380 = vmatprep.subr.bf16.mxu1 %v1700_v33  ;;  %v1701_v57 = vld [vmem:[%s2534_s15 + $0x30] ss:$8 sps:$4 sm:$0xff]  }
 0x43e   :  { %v1026_v26 = vpack.c.bf16 %v1021_v14, %v1020_v22  ;;  %v1023_v28 = vmul.f32 %v1817_v23, %v2389_v60  ;;  %v1706_v60 = vld [vmem:[%s2534_s15 + $0x44] ss:$8 sps:$4 sm:$0xff]  }
 0x43f   :  { %1650 = vmatmul.mubr.msk.bf16.vlgmr.msra.gmra.mrb[24].mxu0 %vm511_vm1, %v1025_v24 }
 0x440   :  { %1653 = vmatprep.mubr.msk.bf16.mxu0 %vm511_vm1, %v1026_v26  ;;  %v1027_v29 = vpack.c.bf16 %v1023_v28, %v1022_v25  ;;  %1381 = vmatpush1.bf16.msra.mxu1 %v1698_v59 }
 0x441   :  { %1382 = vmatprep.subr.bf16.mxu1 %v1703_v62 }
 0x444   :  { %1383 = vmatpush1.bf16.msra.mxu1 %v1701_v57 }
 0x445   :  { %1384 = vmatprep.subr.bf16.mxu1 %v1706_v60  ;;  %v1181_v60 = vld [vmem:[%s2532_s13] sm:$0x1] }
 0x447   :  { %1654 = vmatmul.mubr.msk.bf16.gmra.mrb[28].mxu0 %vm511_vm1, %v1027_v29 }
 0x448   :  { %1385 = vmatpush1.bf16.msra.mxu1 %v1704_v0 }
 0x449   :  { %1386 = vmatprep.subr.bf16.mxu1 %v1709_v7 }
 0x44c   :  { %1387 = vmatpush1.bf16.msra.mxu1 %v1707_v34  ;;  %v1185_v34 = vld [vmem:[%s2533_s14] sm:$0x1] }
 0x44d   :  { %1388 = vmatprep.subr.bf16.mxu1 %v1712_v31 }
 0x450   :  { %1389 = vmatpush1.bf16.msra.mxu1 %v1710_v58 }
 0x451   :  { %1390 = vmatprep.subr.bf16.mxu1 %v1715_v35 }
 0x454   :  { %1391 = vmatpush1.bf16.msra.mxu1 %v1713_v36 }
 0x512   :  { %v2453_v18 = vpop.f32.mrb[24].mxu0 }
 0x513   :  { %v1106_v8 = vpop.f32.mrb[25].mxu0 }
 0x514   :  { %v2455_v37 = vpop.f32.mrb[26].mxu0 }
 0x515   :  { %v1109_v9 = vpop.f32.mrb[27].mxu0 }
 0x516   :  { %v1137_v49 = vadd.f32 %v1109_v9, %v1106_v8 }
 0x518   :  { %v1138_v44 = vadd.f32 %v2453_v18, %v1137_v49 }
 0x51a   :  { %v1655_v46 = vpop.f32.mrb[28].mxu0  ;;  %v1139_v13 = vadd.f32 %v2455_v37, %v1138_v44 }
 0x51b   :  { %v1122_v12 = vpop.f32.mrb[29].mxu0 }
 0x51c   :  { %v1140_v38 = vadd.f32 %v1139_v13, %v1122_v12  ;;  %v1656_v39 = vpop.f32.mrb[30].mxu0 }
 0x51d   :  { %v1125_v16 = vpop.f32.mrb[31].mxu0 }
 0x51e   :  { %v1141_v40 = vadd.f32 %v1140_v38, %v1125_v16 }
 0x520   :  { %v1142_v41 = vadd.f32 %v1655_v46, %v1141_v40 }
 0x522   :  { %v1143_v42 = vadd.f32 %v1656_v39, %v1142_v41 }
 0x524   :  { %v1144_v45 = vrot.slane %v1143_v42, 4 }
 0x526   :  { %v1145_v48 = vadd.f32 %v1144_v45, %v1143_v42 }
 0x528   :  { %v1146_v50 = vrot.slane %v1145_v48, 2 }
 0x52a   :  { %v1147_v51 = vadd.f32 %v1146_v50, %v1145_v48 }
 0x52c   :  { %v1148_v53 = vrot.slane %v1147_v51, 1 }
 0x52e   :  { %v1149_v54 = vadd.f32 %v1148_v53, %v1147_v51 }
 0x530   :  { %v1150_v56 = vmul.f32 0.015625, %v1149_v54 }
 0x532   :  { %v1151_v63 = vsub.f32 %v1106_v8, %v1150_v56  ;;  %v1152_v2 = vsub.f32 %v1109_v9, %v1150_v56  ;;  %v1153_v3 = vsub.f32 %v2453_v18, %v1150_v56  ;;  %v1154_v4 = vsub.f32 %v2455_v37, %v1150_v56 }
 0x533   :  { %v1155_v5 = vsub.f32 %v1122_v12, %v1150_v56  ;;  %v1156_v6 = vsub.f32 %v1125_v16, %v1150_v56  ;;  %v1157_v52 = vsub.f32 %v1655_v46, %v1150_v56  ;;  %v1158_v55 = vsub.f32 %v1656_v39, %v1150_v56 }
 0x534   :  { %v1159_v10 = vmul.f32 %v1151_v63, %v1151_v63  ;;  %v1160_v61 = vmul.f32 %v1152_v2, %v1152_v2  ;;  %v1161_v14 = vmul.f32 %v1153_v3, %v1153_v3  ;;  %v1162_v17 = vmul.f32 %v1154_v4, %v1154_v4 }
 0x535   :  { %v1163_v20 = vmul.f32 %v1155_v5, %v1155_v5  ;;  %v1164_v22 = vmul.f32 %v1156_v6, %v1156_v6  ;;  %v1165_v24 = vmul.f32 %v1157_v52, %v1157_v52  ;;  %v1166_v26 = vmul.f32 %v1158_v55, %v1158_v55 }
 0x536   :  { %v1167_v15 = vadd.f32 %v1160_v61, %v1159_v10 }
 0x538   :  { %v1168_v19 = vadd.f32 %v1167_v15, %v1161_v14 }
 0x53a   :  { %v1169_v21 = vadd.f32 %v1168_v19, %v1162_v17 }
 0x53c   :  { %v1170_v23 = vadd.f32 %v1169_v21, %v1163_v20 }
 0x53e   :  { %v1171_v25 = vadd.f32 %v1170_v23, %v1164_v22 }
 0x540   :  { %v1172_v28 = vadd.f32 %v1171_v25, %v1165_v24 }
 0x542   :  { %v1173_v29 = vadd.f32 %v1172_v28, %v1166_v26 }
 0x544   :  { %v1174_v27 = vrot.slane %v1173_v29, 4 }
 0x546   :  { %v1175_v30 = vadd.f32 %v1174_v27, %v1173_v29 }
 0x548   :  { %v1176_v32 = vrot.slane %v1175_v30, 2 }
 0x54a   :  { %v1177_v11 = vadd.f32 %v1176_v32, %v1175_v30 }
 0x54c   :  { %v1178_v33 = vrot.slane %v1177_v11, 1 }
 0x54e   :  { %v1179_v59 = vadd.f32 %v1178_v33, %v1177_v11 }
 0x550   :  { %v1180_v62 = vmul.f32 0.015625, %v1179_v59 }
 0x552   :  { %v1182_v57 = vadd.f32 1e-05, %v1180_v62 }
 0x554   :  { %1818 = vrsqrt.f32 %v1182_v57 }
 0x55e   :  { %v1819_v0 = vpop.eup %1818 }
 0x55f   :  { %v1184_v7 = vmul.f32 %v1819_v0, %v1181_v60 }
 0x561   :  { %v1186_v31 = vmul.f32 %v1184_v7, %v1150_v56  ;;  %v1192_v58 = vrot.slane %v1184_v7, %v2129_v47 }
 0x563   :  { %v1187_v35 = vsub.f32 %v1185_v34, %v1186_v31  ;;  %v1199_v36 = vmul.f32 %v1192_v58, %v1125_v16  ;;  %v1194_v49 = vmul.f32 %v1192_v58, %v1106_v8  ;;  %v1195_v44 = vmul.f32 %v1192_v58, %v1109_v9 }
 0x564   :  { %v1196_v13 = vmul.f32 %v2453_v18, %v1192_v58  ;;  %v1197_v38 = vmul.f32 %v2455_v37, %v1192_v58  ;;  %v1198_v40 = vmul.f32 %v1192_v58, %v1122_v12  ;;  %v1200_v41 = vmul.f32 %v1655_v46, %v1192_v58 }
 0x565   :  { %v1206_v42 = vrot.slane %v1187_v35, %v2129_v47  ;;  %v1201_v45 = vmul.f32 %v1656_v39, %v1192_v58 }
 0x567   :  { %v2471_v48 = vadd.f32 %v1206_v42, %v1199_v36  ;;  %v1208_v50 = vadd.f32 %v1206_v42, %v1194_v49  ;;  %v1209_v51 = vadd.f32 %v1206_v42, %v1195_v44  ;;  %v1210_v53 = vadd.f32 %v1206_v42, %v1196_v13 }
 0x568   :  { %v2473_v54 = vadd.f32 %v1206_v42, %v1197_v38  ;;  %v2475_v56 = vadd.f32 %v1206_v42, %v1198_v40  ;;  %v2477_v8 = vadd.f32 %v1206_v42, %v1200_v41  ;;  %v2479_v9 = vadd.f32 %v1206_v42, %v1201_v45  ;;  %v1284_v45 = vld [vmem:[%s2535_s16] sm:$0x3]  ;;  %s1877_s16 = smov [#allocation2]  }
 0x569   :  { %v1221_v18 = vsub.f32 0.0, %v2471_v48  ;;  %v1216_v37 = vsub.f32 0.0, %v1208_v50  ;;  %v1217_v46 = vsub.f32 0.0, %v1209_v51  ;;  %v1218_v12 = vsub.f32 0.0, %v1210_v53  ;;  %s1470_s26 = sshll.u32 %s1877_s16, 4  ;;  %s1471_s26 = int_to_ptr.vmem [resolvable:$true] %s1470_s26 }
 0x56a   :  { %v1219_v39 = vsub.f32 0.0, %v2473_v54  ;;  %v1220_v16 = vsub.f32 0.0, %v2475_v56  ;;  %v1222_v63 = vsub.f32 0.0, %v2477_v8  ;;  %v1223_v6 = vsub.f32 0.0, %v2479_v9  ;;  %s1852_s27 = scalar_lea.vmem %s1471_s26, 2048  ;;  %p1857_p1 = scmp.lt.s32.totalorder %s1471_s26, %s1471_s26 }
 0x56b   :  { %v1234_v2 = vmul.f32 1.442695, %v1221_v18  ;;  %v1224_v3 = vmul.f32 1.442695, %v1216_v37  ;;  %v1226_v4 = vmul.f32 1.442695, %v1217_v46  ;;  %p1853_p0 = scmp.ne.s32.totalorder %s1471_s26, %s1852_s27  ;;  %p1858_p2 = scmp.lt.s32.totalorder %s1852_s27, %s1852_s27 }
 0x56c   :  { %v1228_v5 = vmul.f32 1.442695, %v1218_v12  ;;  %v1230_v52 = vmul.f32 1.442695, %v1219_v39  ;;  %v1232_v55 = vmul.f32 1.442695, %v1220_v16 }
 0x56d   :  { %1820 = vpow2.f32 %v1234_v2  ;;  %v1236_v10 = vmul.f32 1.442695, %v1222_v63  ;;  %v1238_v61 = vmul.f32 1.442695, %v1223_v6  ;;  %p1859_p3 = por %p1858_p2, %p1857_p1 }
 0x56e   :  { %1822 = vpow2.f32 %v1224_v3 }
 0x56f   :  { %1824 = vpow2.f32 %v1226_v4  ;;  %p1860_p4 = pnand %p1859_p3, %p1853_p0 }
 0x570   :  { %1826 = vpow2.f32 %v1228_v5 }
 0x571   :  { %1828 = vpow2.f32 %v1230_v52 }
 0x572   :  { %1830 = vpow2.f32 %v1232_v55 }
 0x573   :  { %1832 = vpow2.f32 %v1236_v10 }
 0x574   :  { %1834 = vpow2.f32 %v1238_v61 }
 0x577   :  { %v1821_v14 = vpop.eup %1820 }
 0x578   :  { %v1823_v15 = vpop.eup %1822  ;;  %v1245_v17 = vadd.f32 1.0, %v1821_v14 }
 0x579   :  { %v1825_v19 = vpop.eup %1824  ;;  %v1240_v20 = vadd.f32 1.0, %v1823_v15 }
 0x57a   :  { %v1827_v21 = vpop.eup %1826  ;;  %1836 = vrcp.f32 %v1245_v17  ;;  %v1241_v22 = vadd.f32 1.0, %v1825_v19 }
 0x57b   :  { %v1829_v23 = vpop.eup %1828  ;;  %1838 = vrcp.f32 %v1240_v20  ;;  %v1242_v24 = vadd.f32 1.0, %v1827_v21 }
 0x57c   :  { %v1831_v25 = vpop.eup %1830  ;;  %1840 = vrcp.f32 %v1241_v22  ;;  %v1243_v26 = vadd.f32 1.0, %v1829_v23 }
 0x57d   :  { %v1833_v28 = vpop.eup %1832  ;;  %1842 = vrcp.f32 %v1242_v24  ;;  %v1244_v29 = vadd.f32 1.0, %v1831_v25 }
 0x57e   :  { %v1835_v27 = vpop.eup %1834  ;;  %1844 = vrcp.f32 %v1243_v26  ;;  %v1246_v30 = vadd.f32 1.0, %v1833_v28 }
 0x57f   :  { %1846 = vrcp.f32 %v1244_v29  ;;  %v1247_v32 = vadd.f32 1.0, %v1835_v27 }
 0x580   :  { %1848 = vrcp.f32 %v1246_v30 }
 0x581   :  { %1850 = vrcp.f32 %v1247_v32 }
 0x584   :  { %v1837_v11 = vpop.eup %1836 }
 0x585   :  { %v1839_v33 = vpop.eup %1838  ;;  %v1261_v7 = vmul.f32 %v1837_v11, %v2471_v48  ;;  %v1292_v48 = vsub.s32 1, %v2123_v43 }
 0x586   :  { %v1841_v59 = vpop.eup %1840  ;;  %v1256_v62 = vmul.f32 %v1839_v33, %v1208_v50  ;;  %v1289_v50 = vrot.slane %v1284_v45, %v2129_v47 }
 0x587   :  { %v1843_v57 = vpop.eup %1842  ;;  %v1257_v60 = vmul.f32 %v1841_v59, %v1209_v51  ;;  %v1293_v51 = vrot.slane %v1284_v45, %v1292_v48 }
 0x588   :  { %v1845_v0 = vpop.eup %1844  ;;  %v1258_v34 = vmul.f32 %v1843_v57, %v1210_v53 }
 0x589   :  { %v1847_v31 = vpop.eup %1846  ;;  %v1264_v58 = vpack.c.bf16 %v1257_v60, %v1256_v62  ;;  %v1259_v35 = vmul.f32 %v1845_v0, %v2473_v54 }
 0x58a   :  { %v1849_v36 = vpop.eup %1848  ;;  %v1260_v49 = vmul.f32 %v1847_v31, %v2475_v56 }
 0x58b   :  { %v1851_v44 = vpop.eup %1850  ;;  %1409 = vmatmul.mubr.bf16.vlgmr.msra.gmra.mrb[16].mxu1 %v1264_v58  ;;  %v1265_v13 = vpack.c.bf16 %v1259_v35, %v1258_v34  ;;  %v1262_v38 = vmul.f32 %v1849_v36, %v2477_v8 }
 0x58c   :  { %1418 = vmatprep.mubr.bf16.mxu1 %v1876_v1  ;;  %v1266_v40 = vpack.c.bf16 %v1261_v7, %v1260_v49  ;;  %v1263_v41 = vmul.f32 %v1851_v44, %v2479_v9 }
 0x58e   :  { %v1267_v42 = vpack.c.bf16 %v1263_v41, %v1262_v38 }
 0x593   :  { %1419 = vmatmul.mubr.bf16.gmra.mrb[20].mxu1 %v1265_v13 }
 0x594   :  { %1428 = vmatprep.mubr.bf16.mxu1 %v1876_v1 }
 0x59b   :  { %1429 = vmatmul.mubr.bf16.gmra.mrb[24].mxu1 %v1266_v40 }
 0x59c   :  { %1438 = vmatprep.mubr.bf16.mxu1 %v1876_v1 }
 0x5a3   :  { %1439 = vmatmul.mubr.bf16.gmra.mrb[28].mxu1 %v1267_v42 }
 0x65e   :  { %v1410_v53 = vpop.f32.mrb[16].mxu1 }
 0x65f   :  { %v1411_v54 = vadd.f32 %v1410_v53, %v1289_v50  ;;  %v1412_v56 = vpop.f32.mrb[17].mxu1 }
 0x660   :  { %v1413_v8 = vadd.f32 %v1412_v56, %v1293_v51  ;;  %v1414_v9 = vpop.f32.mrb[18].mxu1 }
 0x661   :  { %1449 = vst [vmem:[#allocation2] sm:$0xff] %v1411_v54  ;;  %v1415_v18 = vadd.f32 %v1414_v9, %v1289_v50  ;;  %v1416_v37 = vpop.f32.mrb[19].mxu1 }
 0x662   :  { %1450 = vst.msk [vmem:[#allocation2 + $0x8] sm:$0xff] %vm172_vm0, %v1413_v8  ;;  %v1417_v1 = vadd.f32 %v1416_v37, %v1293_v51 }
 0x663   :  { %1451 = vst [vmem:[#allocation2 + $0x10] sm:$0xff] %v1415_v18 }
 0x664   :  { %1452 = vst.msk [vmem:[#allocation2 + $0x18] sm:$0xff] %vm172_vm0, %v1417_v1 }
 0x666   :  { %v1420_v46 = vpop.f32.mrb[20].mxu1 }
 0x667   :  { %v1421_v12 = vadd.f32 %v1420_v46, %v1289_v50  ;;  %v1422_v43 = vpop.f32.mrb[21].mxu1 }
 0x668   :  { %v1423_v39 = vadd.f32 %v1422_v43, %v1293_v51  ;;  %v1424_v47 = vpop.f32.mrb[22].mxu1 }
 0x669   :  { %1453 = vst [vmem:[#allocation2 + $0x20] sm:$0xff] %v1421_v12  ;;  %v1425_v16 = vadd.f32 %v1424_v47, %v1289_v50  ;;  %v1426_v63 = vpop.f32.mrb[23].mxu1 }
 0x66a   :  { %1454 = vst.msk [vmem:[#allocation2 + $0x28] sm:$0xff] %vm172_vm0, %v1423_v39  ;;  %v1427_v2 = vadd.f32 %v1426_v63, %v1293_v51 }
 0x66b   :  { %1455 = vst [vmem:[#allocation2 + $0x30] sm:$0xff] %v1425_v16 }
 0x66c   :  { %1456 = vst.msk [vmem:[#allocation2 + $0x38] sm:$0xff] %vm172_vm0, %v1427_v2 }
 0x66e   :  { %v1430_v3 = vpop.f32.mrb[24].mxu1 }
 0x66f   :  { %v1431_v4 = vadd.f32 %v1430_v3, %v1289_v50  ;;  %v1432_v5 = vpop.f32.mrb[25].mxu1 }
 0x670   :  { %v1433_v6 = vadd.f32 %v1432_v5, %v1293_v51  ;;  %v1434_v52 = vpop.f32.mrb[26].mxu1 }
 0x671   :  { %1457 = vst [vmem:[#allocation2 + $0x40] sm:$0xff] %v1431_v4  ;;  %v1435_v55 = vadd.f32 %v1434_v52, %v1289_v50  ;;  %v1436_v10 = vpop.f32.mrb[27].mxu1 }
 0x672   :  { %1458 = vst.msk [vmem:[#allocation2 + $0x48] sm:$0xff] %vm172_vm0, %v1433_v6  ;;  %v1437_v61 = vadd.f32 %v1436_v10, %v1293_v51 }
 0x673   :  { %1459 = vst [vmem:[#allocation2 + $0x50] sm:$0xff] %v1435_v55 }
 0x674   :  { %1460 = vst.msk [vmem:[#allocation2 + $0x58] sm:$0xff] %vm172_vm0, %v1437_v61 }
 0x676   :  { %v1440_v14 = vpop.f32.mrb[28].mxu1 }
 0x677   :  { %v1441_v15 = vadd.f32 %v1440_v14, %v1289_v50  ;;  %v1442_v17 = vpop.f32.mrb[29].mxu1 }
 0x678   :  { %v1443_v19 = vadd.f32 %v1442_v17, %v1293_v51  ;;  %v1444_v20 = vpop.f32.mrb[30].mxu1 }
 0x679   :  { %1461 = vst [vmem:[#allocation2 + $0x60] sm:$0xff] %v1441_v15  ;;  %v1445_v21 = vadd.f32 %v1444_v20, %v1289_v50  ;;  %v1446_v22 = vpop.f32.mrb[31].mxu1 }
 0x67a   :  { %1462 = vst.msk [vmem:[#allocation2 + $0x68] sm:$0xff] %vm172_vm0, %v1443_v19  ;;  %v1447_v23 = vadd.f32 %v1446_v22, %v1293_v51 }
 0x67b   :  { %1463 = vst [vmem:[#allocation2 + $0x70] sm:$0xff] %v1445_v21 }
 0x67c   :  { %1464 = vst.msk [vmem:[#allocation2 + $0x78] sm:$0xff] %vm172_vm0, %v1447_v23 }
 0x67d   :  { %1863 = shalt.err (!%p1860_p4)
}
 0x67e   :  { %s1864_s6 = scalar_lea.hbm %s2536_s17, 2048 }
 0x67f   :  { %p1865_p5 = scmp.ne.s32.totalorder %s2536_s17, %s1864_s6  ;;  %p1868_p6 = scmp.lt.u32.totalorder %s1864_s6, %s2536_s17 }
 0x681   :  { %p1870_p7 = pnand %p1868_p6, %p1865_p5 }
 0x683   :  { %1873 = shalt.err (!%p1870_p7)
}
 0x684   :  { %s1878_s19 = smov 256   ;;  %s1879_s3 = smov 16  }
 0x685   :  { %1476 = dma.vmem_to_hbm [thread:$0]  %s1471_s26, 2048, %s2536_s17, [#allocation3], %s1878_s19, %s1878_s19, %s1879_s3  }
 0x686   :  { %1874 = dma.done.wait [#allocation3], 2048  }
 0x687   :  { %1875 = vsyncadd [#allocation3], 4294965248 }
 0x688   :  { %1484 = vsyncpa [#allocation3], 1 }

</bundles_post_ra>
